<compile_context>
chip_gen: v6e
topology: v6e:2x2x1
jax: 0.10.0
libtpu: 0.0.40
codegen_flags: <defaults>
</compile_context>

<pallas_src>
from functools import partial

import jax
import jax.numpy as jnp
from jax.experimental import pallas as pl
from jax.experimental.pallas import tpu as pltpu


_PREC = jax.lax.Precision.HIGHEST  # fp32-accurate multi-pass MXU matmul


def _mlp_packed_kernel(x_ref, w1_ref, b1_ref, w2_ref, b2_ref, o_ref):
    # x_ref:  (rows_blk, P*in_dim)   -- P samples packed per lane-dense row
    # w1_ref: (P*in_dim, P*hidden)   -- kron(I_P, W1.T), block-diagonal
    # b1_ref: (1, P*hidden)
    # w2_ref: (P*hidden, P*out)      -- kron(I_P, W2.T), block-diagonal
    # b2_ref: (1, P*out)
    # o_ref:  (rows_blk, P*out)
    h = jnp.dot(x_ref[...], w1_ref[...],
                precision=_PREC, preferred_element_type=jnp.float32)
    h = jnp.maximum(h + b1_ref[...], 0.0)          # ReLU
    y = jnp.dot(h, w2_ref[...],
                precision=_PREC, preferred_element_type=jnp.float32)
    o_ref[...] = (y + b2_ref[...]).astype(o_ref.dtype)


@partial(jax.jit, static_argnames=("tb",))
def multiclass_forward(x, w1, b1, w2, b2, *, tb=65536):
    """Forward pass matching torch: fc2(relu(fc1(x))).

    x:  (B, input_dim) float32
    w1: (hidden_dim, input_dim)   b1: (hidden_dim,)   -- PyTorch Linear layout
    w2: (output_dim, hidden_dim)  b2: (output_dim,)
    returns (B, output_dim) float32
    """
    B, in_dim = x.shape
    hidden = w1.shape[0]
    out_dim = w2.shape[0]

    # Pack factor: P samples per packed row.  P*in_dim <= 256 keeps the first
    # matmul's K within a single MXU weight tile.
    P = 16
    while P > 1 and P * in_dim > 256:
        P //= 2

    # Pad the batch only up to a multiple of P (copies x only when B % P != 0).
    Bp = pl.cdiv(B, P) * P
    if Bp != B:
        x = jnp.pad(x, ((0, Bp - B), (0, 0)))
    n_rows = Bp // P
    lin, lhid, lout = P * in_dim, P * hidden, P * out_dim

    # Free, contiguous reshape: no HBM pass (unlike a transpose).
    x_p = x.reshape(n_rows, lin)

    # Block-diagonal weight expansion (tiny: ~0.2 MiB) + tiled biases.
    eye = jnp.eye(P, dtype=x.dtype)
    w1t_big = jnp.kron(eye, w1.T.astype(x.dtype))        # (lin,  lhid)
    w2t_big = jnp.kron(eye, w2.T.astype(x.dtype))        # (lhid, lout)
    b1_big = jnp.tile(b1.astype(x.dtype), P).reshape(1, lhid)
    b2_big = jnp.tile(b2.astype(x.dtype), P).reshape(1, lout)

    # Batch tile: tb samples -> tb // P packed rows (multiple of 8 sublanes).
    rows_blk = (min(tb, Bp) // P) // 8 * 8
    if rows_blk < 8:
        rows_blk = 8
    if n_rows <= rows_blk:
        rows_blk = n_rows                      # single block (any size OK)
    grid = (pl.cdiv(n_rows, rows_blk),)        # partial last block is masked

    # Weights/biases: same (0, 0) block every grid step -> VMEM-resident.
    def resident(a):
        return pl.BlockSpec(a.shape, lambda i: (0,) * a.ndim)

    weight_bytes = (w1t_big.size + w2t_big.size + b1_big.size + b2_big.size) * 4
    cost = pl.CostEstimate(
        flops=2 * n_rows * (lin * lhid + lhid * lout),
        transcendentals=0,
        bytes_accessed=n_rows * (lin + lout) * 4 + weight_bytes,
    )

    out_p = pl.pallas_call(
        _mlp_packed_kernel,
        out_shape=jax.ShapeDtypeStruct((n_rows, lout), x.dtype),
        grid=grid,
        in_specs=[
            pl.BlockSpec((rows_blk, lin), lambda i: (i, 0)),   # streamed x tile
            resident(w1t_big),
            resident(b1_big),
            resident(w2t_big),
            resident(b2_big),
        ],
        out_specs=pl.BlockSpec((rows_blk, lout), lambda i: (i, 0)),
        compiler_params=pltpu.CompilerParams(
            dimension_semantics=("parallel",),     # megacore-shardable batch axis
            vmem_limit_bytes=48 * 1024 * 1024,     # safe on v5e/v6e/v7x
        ),
        cost_estimate=cost,
    )(x_p, w1t_big, b1_big, w2t_big, b2_big)

    out = out_p.reshape(Bp, out_dim)               # free, contiguous reshape
    return out if Bp == B else out[:B]


def init_params(key, input_dim, hidden_dim=16, output_dim=6):
    """PyTorch nn.Linear-style init: U[-1/sqrt(fan_in), 1/sqrt(fan_in)]."""
    k1, k2, k3, k4 = jax.random.split(key, 4)
    bound1 = 1.0 / jnp.sqrt(input_dim)
    bound2 = 1.0 / jnp.sqrt(hidden_dim)
    w1 = jax.random.uniform(k1, (hidden_dim, input_dim), jnp.float32, -bound1, bound1)
    b1 = jax.random.uniform(k2, (hidden_dim,), jnp.float32, -bound1, bound1)
    w2 = jax.random.uniform(k3, (output_dim, hidden_dim), jnp.float32, -bound2, bound2)
    b2 = jax.random.uniform(k4, (output_dim,), jnp.float32, -bound2, bound2)
    return w1, b1, w2, b2


def _ref_forward(x, w1, b1, w2, b2):
    h = jnp.maximum(jnp.dot(x, w1.T, precision=_PREC) + b1, 0.0)
    return jnp.dot(h, w2.T, precision=_PREC) + b2


def _check(out, ref):
    # Tolerance covers a possible single-pass-bf16 lowering of the f32 dots on
    # either side; with HIGHEST honored, the actual difference is ~1e-6.
    return bool(jnp.allclose(out, ref, atol=2e-3, rtol=2e-3))


if __name__ == "__main__":
    key = jax.random.PRNGKey(0)
    k_x, k_p, k_x2, k_x3 = jax.random.split(key, 4)

    batch, input_dim, hidden_dim, output_dim = 8, 8, 16, 6
    x = jax.random.normal(k_x, (batch, input_dim), jnp.float32)
    w1, b1, w2, b2 = init_params(k_p, input_dim, hidden_dim, output_dim)

    # Small-shape check (single grid step).
    out = jax.block_until_ready(multiclass_forward(x, w1, b1, w2, b2))
    ref = _ref_forward(x, w1, b1, w2, b2)
    assert out.shape == (batch, output_dim)
    assert _check(out, ref)

    # Batch that is not a multiple of the pack factor (exercises the small pad).
    xb = jax.random.normal(k_x2, (1000, input_dim), jnp.float32)
    outb = jax.block_until_ready(multiclass_forward(xb, w1, b1, w2, b2))
    refb = _ref_forward(xb, w1, b1, w2, b2)
    assert outb.shape == (1000, output_dim)
    assert _check(outb, refb)

    # Multi-step grid with a masked partial last block (small tb to force it).
    xc = jax.random.normal(k_x3, (10000, input_dim), jnp.float32)
    outc = jax.block_until_ready(multiclass_forward(xc, w1, b1, w2, b2, tb=4096))
    refc = _ref_forward(xc, w1, b1, w2, b2)
    assert outc.shape == (10000, output_dim)
    assert _check(outc, refc)

    print("KERNEL_OK")
</pallas_src>

<mosaic_0001>
module attributes {stable_mosaic.version = 11 : i64} {
  func.func @_mlp_packed_kernel(%arg0: i32, %arg1: memref<1x128xf32, #tpu.memory_space<vmem>>, %arg2: memref<128x256xf32, #tpu.memory_space<vmem>>, %arg3: memref<1x256xf32, #tpu.memory_space<vmem>>, %arg4: memref<256x96xf32, #tpu.memory_space<vmem>>, %arg5: memref<1x96xf32, #tpu.memory_space<vmem>>, %arg6: memref<1x96xf32, #tpu.memory_space<vmem>>) attributes {dimension_semantics = [#tpu.dimension_semantics<parallel>], iteration_bounds = array<i64: 1>, scalar_prefetch = 0 : i64, scratch_operands = 0 : i64, tpu.core_type = #tpu.core_type<tc>, window_params = [{transform_indices = @transform_0, window_bounds = array<i64: 1, 128>}, {pipeline_mode = #tpu.pipeline_mode<synchronous>, transform_indices = @transform_1, window_bounds = array<i64: 128, 256>}, {pipeline_mode = #tpu.pipeline_mode<synchronous>, transform_indices = @transform_2, window_bounds = array<i64: 1, 256>}, {pipeline_mode = #tpu.pipeline_mode<synchronous>, transform_indices = @transform_3, window_bounds = array<i64: 256, 96>}, {pipeline_mode = #tpu.pipeline_mode<synchronous>, transform_indices = @transform_4, window_bounds = array<i64: 1, 96>}, {transform_indices = @transform_5, window_bounds = array<i64: 1, 96>}]} {
    %c0 = arith.constant 0 : index
    %c0_0 = arith.constant 0 : index
    %0 = vector.load %arg1[%c0, %c0_0] : memref<1x128xf32, #tpu.memory_space<vmem>>, vector<1x128xf32>
    %c0_1 = arith.constant 0 : index
    %c0_2 = arith.constant 0 : index
    %1 = vector.load %arg2[%c0_1, %c0_2] : memref<128x256xf32, #tpu.memory_space<vmem>>, vector<128x256xf32>
    %cst = arith.constant dense<0.000000e+00> : vector<1x256xf32>
    %2 = tpu.matmul %0, %1, %cst {dimension_numbers = #tpu.dot_dimension_numbers<[1], [0], [0], [1], [0, 0, 1, 1], [], []>, precision = #tpu.contract_precision<fp32>} : vector<1x128xf32>, vector<128x256xf32>, vector<1x256xf32> -> vector<1x256xf32>
    %c0_3 = arith.constant 0 : index
    %c0_4 = arith.constant 0 : index
    %3 = vector.load %arg3[%c0_3, %c0_4] : memref<1x256xf32, #tpu.memory_space<vmem>>, vector<1x256xf32>
    %4 = arith.addf %2, %3 : vector<1x256xf32>
    %cst_5 = arith.constant 0.000000e+00 : f32
    %5 = vector.broadcast %cst_5 : f32 to vector<1x256xf32>
    %6 = arith.maximumf %4, %5 : vector<1x256xf32>
    %c0_6 = arith.constant 0 : index
    %c0_7 = arith.constant 0 : index
    %7 = vector.load %arg4[%c0_6, %c0_7] : memref<256x96xf32, #tpu.memory_space<vmem>>, vector<256x96xf32>
    %cst_8 = arith.constant dense<0.000000e+00> : vector<1x96xf32>
    %8 = tpu.matmul %6, %7, %cst_8 {dimension_numbers = #tpu.dot_dimension_numbers<[1], [0], [0], [1], [0, 0, 1, 1], [], []>, precision = #tpu.contract_precision<fp32>} : vector<1x256xf32>, vector<256x96xf32>, vector<1x96xf32> -> vector<1x96xf32>
    %c0_9 = arith.constant 0 : index
    %c0_10 = arith.constant 0 : index
    %9 = vector.load %arg5[%c0_9, %c0_10] : memref<1x96xf32, #tpu.memory_space<vmem>>, vector<1x96xf32>
    %10 = arith.addf %8, %9 : vector<1x96xf32>
    %c0_11 = arith.constant 0 : index
    %c0_12 = arith.constant 0 : index
    %11 = vector.load %arg6[%c0_11, %c0_12] : memref<1x96xf32, #tpu.memory_space<vmem>>, vector<1x96xf32>
    tpu.vector_store %arg6[%c0_11, %c0_12], %10 {strides = array<i32>} : memref<1x96xf32, #tpu.memory_space<vmem>>, vector<1x96xf32>,
    return
  }
  func.func @transform_0(%arg0: i32) -> (i32, i32) {
    %c0_i32 = arith.constant 0 : i32
    %c0_i32_0 = arith.constant 0 : i32
    return %arg0, %c0_i32 : i32, i32
  }
  func.func @transform_1(%arg0: i32) -> (i32, i32) {
    %c0_i32 = arith.constant 0 : i32
    %c0_i32_0 = arith.constant 0 : i32
    %c0_i32_1 = arith.constant 0 : i32
    return %c0_i32, %c0_i32_0 : i32, i32
  }
  func.func @transform_2(%arg0: i32) -> (i32, i32) {
    %c0_i32 = arith.constant 0 : i32
    %c0_i32_0 = arith.constant 0 : i32
    %c0_i32_1 = arith.constant 0 : i32
    return %c0_i32, %c0_i32_0 : i32, i32
  }
  func.func @transform_3(%arg0: i32) -> (i32, i32) {
    %c0_i32 = arith.constant 0 : i32
    %c0_i32_0 = arith.constant 0 : i32
    %c0_i32_1 = arith.constant 0 : i32
    return %c0_i32, %c0_i32_0 : i32, i32
  }
  func.func @transform_4(%arg0: i32) -> (i32, i32) {
    %c0_i32 = arith.constant 0 : i32
    %c0_i32_0 = arith.constant 0 : i32
    %c0_i32_1 = arith.constant 0 : i32
    return %c0_i32, %c0_i32_0 : i32, i32
  }
  func.func @transform_5(%arg0: i32) -> (i32, i32) {
    %c0_i32 = arith.constant 0 : i32
    %c0_i32_0 = arith.constant 0 : i32
    return %arg0, %c0_i32 : i32, i32
  }
}

</mosaic_0001>

<bundles_post_ra>
// kernel: tile.13
= control target key start
LH: loop header
LB: loop body
LE: loop exit
PB: predicated region body
PF: predicated region fallthrough
CT: control target
= control target key end

     0   :  { %s28_s0 = inlined_call_operand.vmem [shape: f32[16], index: 0, kind: input, shape index: {}]   ;;  %s29_s1 = inlined_call_operand.vmem [shape: f32[16,16], index: 1, kind: output, shape index: {}]  }
   0x1   :  { %v4_v0 = vld [vmem:[%s28_s0] ss:$0 sm:$0xff] }
   0x2   :  { %5 = vst [vmem:[%s29_s1] sm:$0xff] %v4_v0  ;;  %8 = vst [vmem:[%s29_s1 + $0x8] sm:$0xff] %v4_v0 }

// kernel: tile.14
= control target key start
LH: loop header
LB: loop body
LE: loop exit
PB: predicated region body
PF: predicated region fallthrough
CT: control target
= control target key end

     0   :  { %s7_s6 = smov 3  ;;  %s21_s9 = smov 3  ;;  %vm4_vm0 = vcmask 130048   ;;  %vm11_vm1 = vcmask 1048448   ;;  %vm18_vm2 = vcmask 917248   ;;  %vm25_vm3 = vcmask 786048   ;;  %s131_s0 = inlined_call_operand.vmem [shape: f32[16,16], index: 0, kind: input, shape index: {}]   ;;  %s132_s1 = inlined_call_operand.vmem [shape: f32[1,256], index: 1, kind: output, shape index: {}]  }
   0x1   :  { %v69_v0 = vld [vmem:[%s131_s0 + $0x7] ss:$8 sm:%s7_s6]   ;;  %s84_s10 = smov 112   ;;  %v71_v1 = vld [vmem:[%s131_s0 + $0x5] ss:$8 sm:%s21_s9]   ;;  %s14_s13 = smov 3 }
   0x2   :  { %9 = vrot.lane.b32.xlu0 %v69_v0, %s84_s10  ;;  %s85_s14 = smov 80   ;;  %v70_v2 = vld [vmem:[%s131_s0 + $0x6] ss:$8 sm:%s14_s13]   ;;  %s28_s17 = smov 3  ;;  %vm32_vm4 = vcmask 654848   ;;  %vm39_vm5 = vcmask 523648  }
   0x3   :  { %23 = vrot.lane.b32.xlu1 %v71_v1, %s85_s14  ;;  %v72_v3 = vld [vmem:[%s131_s0 + $0x4] ss:$8 sm:%s28_s17]   ;;  %s35_s20 = smov 3  ;;  %s42_s21 = smov 3  ;;  %vm46_vm6 = vcmask 392448   ;;  %vm53_vm7 = vcmask 261248  }
   0x4   :  { %s86_s22 = smov 96   ;;  %s87_s23 = smov 64   ;;  %v73_v4 = vld [vmem:[%s131_s0 + $0x3] ss:$8 sm:%s35_s20]   ;;  %v74_v5 = vld [vmem:[%s131_s0 + $0x2] ss:$8 sm:%s42_s21]  }
   0x5   :  { %s2_s26 = smov 3  ;;  %s49_s29 = smov 3 }
   0x6   :  { %16 = vrot.lane.b32.xlu0 %v70_v2, %s86_s22  ;;  %v3_v6 = vld [vmem:[%s131_s0] ss:$8 sm:%s2_s26]   ;;  %s88_s3 = smov 48   ;;  %s89_s4 = smov 32  }
   0x7   :  { %30 = vrot.lane.b32.xlu1 %v72_v3, %s87_s23  ;;  %5 = vst.msk [vmem:[#allocation0] ss:$8 sm:$0x3] %vm4_vm0, %v3_v6   ;;  %v75_v7 = vld [vmem:[%s131_s0 + $0x1] ss:$8 sm:%s49_s29]   ;;  %s90_s0 = smov 16  }
   0xa   :  { %37 = vrot.lane.b32.xlu0 %v73_v4, %s88_s3 }
   0xb   :  { %44 = vrot.lane.b32.xlu1 %v74_v5, %s89_s4 }
   0xe   :  { %51 = vrot.lane.b32.xlu0 %v75_v7, %s90_s0 }
  0x74   :  { %v10_v8 = vpop.permute.xlu0 %9  }
  0x75   :  { %12 = vst.msk [vmem:[#allocation0] ss:$8 sm:$0x3] %vm11_vm1, %v10_v8   ;;  %v24_v9 = vpop.permute.xlu1 %23  }
  0x78   :  { %v17_v10 = vpop.permute.xlu0 %16  }
  0x79   :  { %19 = vst.msk [vmem:[#allocation0] ss:$8 sm:$0x3] %vm18_vm2, %v17_v10   ;;  %v31_v11 = vpop.permute.xlu1 %30  }
  0x7a   :  { %26 = vst.msk [vmem:[#allocation0] ss:$8 sm:$0x3] %vm25_vm3, %v24_v9  }
  0x7b   :  { %33 = vst.msk [vmem:[#allocation0] ss:$8 sm:$0x3] %vm32_vm4, %v31_v11  }
  0x7c   :  { %v38_v12 = vpop.permute.xlu0 %37  }
  0x7d   :  { %40 = vst.msk [vmem:[#allocation0] ss:$8 sm:$0x3] %vm39_vm5, %v38_v12   ;;  %v45_v13 = vpop.permute.xlu1 %44  }
  0x7e   :  { %47 = vst.msk [vmem:[#allocation0] ss:$8 sm:$0x3] %vm46_vm6, %v45_v13  }
  0x80   :  { %v52_v14 = vpop.permute.xlu0 %51  }
  0x81   :  { %54 = vst.msk [vmem:[#allocation0] ss:$8 sm:$0x3] %vm53_vm7, %v52_v14  }
  0x88   :  { %v59_v15 = vld [vmem:[#allocation0] sm:$0x1]  ;;  %v64_v16 = vld [vmem:[#allocation0 + $0x8] sm:$0x1] }
  0x89   :  { %62 = vst [vmem:[%s132_s1] sm:$0x1] %v59_v15  ;;  %76 = vst [vmem:[%s132_s1 + $0x1] sm:$0x1] %v64_v16 }

// kernel: tile.18
= control target key start
LH: loop header
LB: loop body
LE: loop exit
PB: predicated region body
PF: predicated region fallthrough
CT: control target
= control target key end

     0   :  { %s28_s0 = inlined_call_operand.vmem [shape: f32[6], index: 0, kind: input, shape index: {}]   ;;  %s29_s1 = inlined_call_operand.vmem [shape: f32[16,6], index: 1, kind: output, shape index: {}]  }
   0x1   :  { %v4_v0 = vld [vmem:[%s28_s0] ss:$0 sm:$0xff] }
   0x2   :  { %5 = vst [vmem:[%s29_s1] sm:$0xff] %v4_v0  ;;  %8 = vst [vmem:[%s29_s1 + $0x8] sm:$0xff] %v4_v0 }

// kernel: tile.19
= control target key start
LH: loop header
LB: loop body
LE: loop exit
PB: predicated region body
PF: predicated region fallthrough
CT: control target
= control target key end

     0   :  { %s133_s10 = smov 90   ;;  %s134_s11 = smov 78   ;;  %vm3_vm0 = vcmask 48128   ;;  %vm9_vm1 = vcmask 786128   ;;  %vm15_vm2 = vcmask 736928   ;;  %vm21_vm3 = vcmask 687728   ;;  %s209_s0 = inlined_call_operand.vmem [shape: f32[16,6], index: 0, kind: input, shape index: {}]   ;;  %s210_s1 = inlined_call_operand.vmem [shape: f32[1,96], index: 1, kind: output, shape index: {}]  }
   0x1   :  { %v103_v0 = vld [vmem:[%s209_s0 + $0xf] sm:$0x1]   ;;  %v105_v1 = vld [vmem:[%s209_s0 + $0xd] sm:$0x1]   ;;  %v104_v2 = vld [vmem:[%s209_s0 + $0xe] sm:$0x1]  }
   0x2   :  { %7 = vrot.lane.b32.xlu0 %v103_v0, %s133_s10  ;;  %19 = vrot.lane.b32.xlu1 %v105_v1, %s134_s11  ;;  %v106_v3 = vld [vmem:[%s209_s0 + $0xc] sm:$0x1]   ;;  %s135_s16 = smov 84   ;;  %s136_s17 = smov 72   ;;  %v107_v4 = vld [vmem:[%s209_s0 + $0xb] sm:$0x1]  }
   0x3   :  { %v108_v5 = vld [vmem:[%s209_s0 + $0xa] sm:$0x1]   ;;  %v2_v6 = vld [vmem:[%s209_s0] sm:$0x1]   ;;  %s137_s24 = smov 66   ;;  %s138_s25 = smov 60  }
   0x4   :  { %4 = vst.msk [vmem:[#allocation0] sm:$0x1] %vm3_vm0, %v2_v6   ;;  %v109_v7 = vld [vmem:[%s209_s0 + $0x9] sm:$0x1]   ;;  %v110_v8 = vld [vmem:[%s209_s0 + $0x8] sm:$0x1]  }
   0x5   :  { %s139_s30 = smov 54   ;;  %s140_s2 = smov 48   ;;  %v111_v9 = vld [vmem:[%s209_s0 + $0x7] sm:$0x1]   ;;  %v112_v10 = vld [vmem:[%s209_s0 + $0x6] sm:$0x1]  }
   0x6   :  { %13 = vrot.lane.b32.xlu0 %v104_v2, %s135_s16  ;;  %25 = vrot.lane.b32.xlu1 %v106_v3, %s136_s17  ;;  %s141_s7 = smov 42   ;;  %s142_s8 = smov 36   ;;  %v113_v11 = vld [vmem:[%s209_s0 + $0x5] sm:$0x1]   ;;  %v114_v12 = vld [vmem:[%s209_s0 + $0x4] sm:$0x1]  }
   0x7   :  { %s143_s13 = smov 30   ;;  %s144_s14 = smov 24   ;;  %v115_v13 = vld [vmem:[%s209_s0 + $0x3] sm:$0x1]   ;;  %v116_v14 = vld [vmem:[%s209_s0 + $0x2] sm:$0x1]  }
   0x8   :  { %s145_s19 = smov 18   ;;  %s146_s20 = smov 12   ;;  %v117_v15 = vld [vmem:[%s209_s0 + $0x1] sm:$0x1]   ;;  %vm27_vm4 = vcmask 638528   ;;  %vm33_vm5 = vcmask 589328  }
   0x9   :  { %s147_s0 = smov 6   ;;  %vm39_vm6 = vcmask 540128   ;;  %vm45_vm7 = vcmask 490928   ;;  %vm51_vm8 = vcmask 441728   ;;  %vm57_vm9 = vcmask 392528  }
   0xa   :  { %31 = vrot.lane.b32.xlu0 %v107_v4, %s137_s24  ;;  %37 = vrot.lane.b32.xlu1 %v108_v5, %s138_s25  ;;  %vm63_vm10 = vcmask 343328   ;;  %vm69_vm11 = vcmask 294128   ;;  %vm75_vm12 = vcmask 244928   ;;  %vm81_vm13 = vcmask 195728  }
   0xb   :  { %vm87_vm14 = vcmask 146528   ;;  %vm93_vm15 = vcmask 97328  }
   0xe   :  { %43 = vrot.lane.b32.xlu0 %v109_v7, %s139_s30  ;;  %49 = vrot.lane.b32.xlu1 %v110_v8, %s140_s2 }
  0x12   :  { %55 = vrot.lane.b32.xlu0 %v111_v9, %s141_s7  ;;  %61 = vrot.lane.b32.xlu1 %v112_v10, %s142_s8 }
  0x16   :  { %67 = vrot.lane.b32.xlu0 %v113_v11, %s143_s13  ;;  %73 = vrot.lane.b32.xlu1 %v114_v12, %s144_s14 }
  0x1a   :  { %79 = vrot.lane.b32.xlu0 %v115_v13, %s145_s19  ;;  %85 = vrot.lane.b32.xlu1 %v116_v14, %s146_s20 }
  0x1e   :  { %91 = vrot.lane.b32.xlu0 %v117_v15, %s147_s0 }
  0x74   :  { %v8_v16 = vpop.permute.xlu0 %7   ;;  %v20_v17 = vpop.permute.xlu1 %19  }
  0x75   :  { %10 = vst.msk [vmem:[#allocation0] sm:$0x1] %vm9_vm1, %v8_v16  }
  0x78   :  { %v14_v18 = vpop.permute.xlu0 %13   ;;  %v26_v19 = vpop.permute.xlu1 %25  }
  0x79   :  { %16 = vst.msk [vmem:[#allocation0] sm:$0x1] %vm15_vm2, %v14_v18  }
  0x7a   :  { %22 = vst.msk [vmem:[#allocation0] sm:$0x1] %vm21_vm3, %v20_v17  }
  0x7b   :  { %28 = vst.msk [vmem:[#allocation0] sm:$0x1] %vm27_vm4, %v26_v19  }
  0x7c   :  { %v32_v20 = vpop.permute.xlu0 %31   ;;  %v38_v21 = vpop.permute.xlu1 %37  }
  0x7d   :  { %34 = vst.msk [vmem:[#allocation0] sm:$0x1] %vm33_vm5, %v32_v20  }
  0x7e   :  { %40 = vst.msk [vmem:[#allocation0] sm:$0x1] %vm39_vm6, %v38_v21  }
  0x80   :  { %v44_v22 = vpop.permute.xlu0 %43   ;;  %v50_v23 = vpop.permute.xlu1 %49  }
  0x81   :  { %46 = vst.msk [vmem:[#allocation0] sm:$0x1] %vm45_vm7, %v44_v22  }
  0x82   :  { %52 = vst.msk [vmem:[#allocation0] sm:$0x1] %vm51_vm8, %v50_v23  }
  0x84   :  { %v56_v24 = vpop.permute.xlu0 %55   ;;  %v62_v25 = vpop.permute.xlu1 %61  }
  0x85   :  { %58 = vst.msk [vmem:[#allocation0] sm:$0x1] %vm57_vm9, %v56_v24  }
  0x86   :  { %64 = vst.msk [vmem:[#allocation0] sm:$0x1] %vm63_vm10, %v62_v25  }
  0x88   :  { %v68_v26 = vpop.permute.xlu0 %67   ;;  %v74_v27 = vpop.permute.xlu1 %73  }
  0x89   :  { %70 = vst.msk [vmem:[#allocation0] sm:$0x1] %vm69_vm11, %v68_v26  }
  0x8a   :  { %76 = vst.msk [vmem:[#allocation0] sm:$0x1] %vm75_vm12, %v74_v27  }
  0x8c   :  { %v80_v28 = vpop.permute.xlu0 %79   ;;  %v86_v29 = vpop.permute.xlu1 %85  }
  0x8d   :  { %82 = vst.msk [vmem:[#allocation0] sm:$0x1] %vm81_vm13, %v80_v28  }
  0x8e   :  { %88 = vst.msk [vmem:[#allocation0] sm:$0x1] %vm87_vm14, %v86_v29  }
  0x90   :  { %v92_v30 = vpop.permute.xlu0 %91  }
  0x91   :  { %94 = vst.msk [vmem:[#allocation0] sm:$0x1] %vm93_vm15, %v92_v30  }
  0x98   :  { %v99_v31 = vld [vmem:[#allocation0] sm:$0x1] }
  0x99   :  { %102 = vst [vmem:[%s210_s1] sm:$0x1] %v99_v31 }

// kernel: multiclass_forward.1
= control target key start
LH: loop header
LB: loop body
LE: loop exit
PB: predicated region body
PF: predicated region fallthrough
CT: control target
= control target key end

     0   :  { %v3383_v3 = vmov 0.0   ;;  %vm1817_vm0 = vcmask 778240   ;;  %s3363_s1 = inlined_call_operand.vmem [shape: f32[128,256], index: 1, kind: input, shape index: {}]   ;;  %s3364_s0 = inlined_call_operand.vmem [shape: f32[1,128], index: 0, kind: input, shape index: {}]   ;;  %s3365_s3 = inlined_call_operand.vmem [shape: f32[256,96], index: 3, kind: input, shape index: {}]   ;;  %s3366_s2 = inlined_call_operand.vmem [shape: f32[1,256], index: 2, kind: input, shape index: {}]   ;;  %s3367_s4 = inlined_call_operand.vmem [shape: f32[1,96], index: 4, kind: input, shape index: {}]   ;;  %s3368_s5 = inlined_call_operand.vmem [shape: f32[1,96], index: 5, kind: output, shape index: {}]  }
   0x1   :  { %v52_v0 = vld [vmem:[%s3363_s1 + $0xf8] sm:$0xff]  ;;  %v51_v1 = vld [vmem:[%s3363_s1 + $0xf0] sm:$0xff]  ;;  %v50_v2 = vld [vmem:[%s3363_s1 + $0xe8] sm:$0xff]  ;;  %161 = vmatprep.mubr.f32.mxu0 %v3383_v3  ;;  %397 = vmatprep.mubr.f32.mxu1 %v3383_v3 }
   0x2   :  { %v2076_v4 = vand.u32 4294901760, %v52_v0  ;;  %v2078_v5 = vand.u32 4294901760, %v51_v1  ;;  %v2080_v6 = vand.u32 4294901760, %v50_v2  ;;  %v49_v7 = vld [vmem:[%s3363_s1 + $0xe0] sm:$0xff]  ;;  %v48_v8 = vld [vmem:[%s3363_s1 + $0xd8] sm:$0xff]  ;;  %v47_v9 = vld [vmem:[%s3363_s1 + $0xd0] sm:$0xff] }
   0x3   :  { %v2091_v10 = vand.u32 4294901760, %v49_v7  ;;  %v2093_v11 = vand.u32 4294901760, %v48_v8  ;;  %v2095_v12 = vand.u32 4294901760, %v47_v9  ;;  %v46_v13 = vld [vmem:[%s3363_s1 + $0xc8] sm:$0xff]  ;;  %v45_v14 = vld [vmem:[%s3363_s1 + $0xc0] sm:$0xff]  ;;  %v44_v15 = vld [vmem:[%s3363_s1 + $0xb8] sm:$0xff] }
   0x4   :  { %66 = vmatprep.subr.mxu0 %v2076_v4  ;;  %v2107_v16 = vand.u32 4294901760, %v46_v13  ;;  %v2109_v17 = vand.u32 4294901760, %v45_v14  ;;  %v2111_v18 = vand.u32 4294901760, %v44_v15  ;;  %v2114_v19 = vsub.f32 %v52_v0, %v2076_v4  ;;  %v2119_v20 = vld [vmem:[%s3363_s1 + $0xb0] sm:$0xff]  ;;  %v2124_v21 = vld [vmem:[%s3363_s1 + $0xa8] sm:$0xff]  ;;  %v2129_v22 = vld [vmem:[%s3363_s1 + $0xa0] sm:$0xff] }
   0x5   :  { %68 = vmatpush1.msra.mxu0 %v2078_v5  ;;  %v2133_v23 = vand.u32 4294901760, %v2119_v20  ;;  %v2136_v24 = vsub.f32 %v51_v1, %v2078_v5  ;;  %v2139_v25 = vand.u32 4294901760, %v2124_v21  ;;  %v2142_v26 = vsub.f32 %v50_v2, %v2080_v6  ;;  %v2147_v27 = vld [vmem:[%s3363_s1 + $0x98] sm:$0xff]  ;;  %v2152_v28 = vld [vmem:[%s3363_s1 + $0x90] sm:$0xff]  ;;  %v2157_v29 = vld [vmem:[%s3363_s1 + $0x88] sm:$0xff] }
   0x6   :  { %70 = vmatprep.subr.mxu0 %v2080_v6  ;;  %v3382_v30 = vand.u32 4294901760, %v2114_v19  ;;  %v2162_v31 = vand.u32 4294901760, %v2129_v22  ;;  %v2165_v32 = vsub.f32 %v49_v7, %v2091_v10  ;;  %v2168_v33 = vand.u32 4294901760, %v2147_v27  ;;  %v2182_v38 = vld [vmem:[%s3363_s1 + $0x80] sm:$0xff]  ;;  %v2209_v47 = vld [vmem:[%s3363_s1 + $0x78] sm:$0xff]  ;;  %v2222_v52 = vld [vmem:[%s3363_s1 + $0x70] sm:$0xff] }
   0x7   :  { %72 = vmatpush1.msra.mxu0 %v2091_v10  ;;  %v3380_v34 = vand.u32 4294901760, %v2136_v24  ;;  %v3379_v35 = vand.u32 4294901760, %v2142_v26  ;;  %v2174_v36 = vsub.f32 %v48_v8, %v2093_v11  ;;  %v2177_v37 = vand.u32 4294901760, %v2152_v28  ;;  %v2232_v57 = vld [vmem:[%s3363_s1 + $0x68] sm:$0xff]  ;;  %v2247_v62 = vld [vmem:[%s3363_s1 + $0x60] sm:$0xff]  ;;  %v2262_v7 = vld [vmem:[%s3363_s1 + $0x58] sm:$0xff] }
   0x8   :  { %3512 = vst [vmem:[#allocation2_spill] sm:$0xff] %v2168_v33  ;;  %74 = vmatprep.subr.mxu0 %v2093_v11  ;;  %v176_v39 = vsub.f32 %v2114_v19, %v3382_v30  ;;  %v3377_v40 = vand.u32 4294901760, %v2165_v32  ;;  %v2190_v41 = vsub.f32 %v47_v9, %v2095_v12  ;;  %v2193_v42 = vand.u32 4294901760, %v2157_v29  ;;  %v2398_v30 = vld [vmem:[%s3363_s1 + $0x18] sm:$0xff] }
   0x9   :  { %3513 = vst [vmem:[#allocation3_spill] sm:$0xff] %v2177_v37  ;;  %76 = vmatpush1.msra.mxu0 %v2095_v12  ;;  %v182_v43 = vsub.f32 %v2136_v24, %v3380_v34  ;;  %v188_v44 = vsub.f32 %v2142_v26, %v3379_v35  ;;  %v3375_v45 = vand.u32 4294901760, %v2174_v36  ;;  %v2204_v46 = vsub.f32 %v46_v13, %v2107_v16 }
   0xa   :  { %3514 = vst [vmem:[#allocation4_spill] sm:$0xff] %v2193_v42  ;;  %78 = vmatprep.subr.mxu0 %v2107_v16  ;;  %v177_v48 = vand.u32 4294901760, %v176_v39  ;;  %v194_v49 = vsub.f32 %v2165_v32, %v3377_v40  ;;  %v3374_v50 = vand.u32 4294901760, %v2190_v41  ;;  %v2217_v51 = vand.u32 4294901760, %v2182_v38  ;;  %v2371_v40 = vld [vmem:[%s3363_s1 + $0x28] sm:$0xff] }
   0xb   :  { %80 = vmatpush1.msra.mxu0 %v2109_v17  ;;  %v183_v53 = vand.u32 4294901760, %v182_v43  ;;  %v189_v54 = vand.u32 4294901760, %v188_v44  ;;  %v200_v55 = vsub.f32 %v2174_v36, %v3375_v45  ;;  %v3372_v56 = vand.u32 4294901760, %v2204_v46  ;;  %v2355_v45 = vld [vmem:[%s3363_s1 + $0x30] sm:$0xff] }
   0xc   :  { %3515 = vst [vmem:[#allocation5_spill] sm:$0xff] %v2217_v51  ;;  %82 = vmatprep.subr.mxu0 %v2111_v18  ;;  %178 = vmatprep.subr.mxu1 %v177_v48  ;;  %v195_v58 = vand.u32 4294901760, %v194_v49  ;;  %v206_v59 = vsub.f32 %v2190_v41, %v3374_v50  ;;  %v2239_v60 = vsub.f32 %v45_v14, %v2109_v17  ;;  %v2242_v61 = vand.u32 4294901760, %v2209_v47 }
   0xd   :  { %84 = vmatpush1.msra.mxu0 %v2133_v23  ;;  %184 = vmatpush1.msra.mxu1 %v183_v53  ;;  %v201_v63 = vand.u32 4294901760, %v200_v55  ;;  %v212_v0 = vsub.f32 %v2204_v46, %v3372_v56  ;;  %v2254_v1 = vsub.f32 %v44_v15, %v2111_v18  ;;  %v2257_v2 = vand.u32 4294901760, %v2222_v52  ;;  %v2276_v15 = vld [vmem:[%s3363_s1 + $0x50] sm:$0xff] }
   0xe   :  { %3516 = vst [vmem:[#allocation6_spill] sm:$0xff] %v2242_v61  ;;  %86 = vmatprep.subr.mxu0 %v2139_v25  ;;  %190 = vmatprep.subr.mxu1 %v189_v54  ;;  %v207_v8 = vand.u32 4294901760, %v206_v59  ;;  %v3370_v9 = vand.u32 4294901760, %v2239_v60  ;;  %v2268_v13 = vsub.f32 %v2119_v20, %v2133_v23  ;;  %v2271_v14 = vand.u32 4294901760, %v2232_v57 }
   0xf   :  { %3517 = vst [vmem:[#allocation7_spill] sm:$0xff] %v2257_v2  ;;  %88 = vmatpush1.msra.mxu0 %v2162_v31  ;;  %196 = vmatpush1.msra.mxu1 %v195_v58  ;;  %v213_v39 = vand.u32 4294901760, %v212_v0  ;;  %v3369_v43 = vand.u32 4294901760, %v2254_v1  ;;  %v2282_v44 = vsub.f32 %v2124_v21, %v2139_v25  ;;  %v2285_v20 = vand.u32 4294901760, %v2247_v62  ;;  %v2302_v21 = vld [vmem:[%s3363_s1 + $0x48] sm:$0xff] }
  0x10   :  { %3518 = vst [vmem:[#allocation8_spill] sm:$0xff] %v2271_v14  ;;  %90 = vmatprep.subr.mxu0 %v2168_v33  ;;  %202 = vmatprep.subr.mxu1 %v201_v63  ;;  %v218_v48 = vsub.f32 %v2239_v60, %v3370_v9  ;;  %v3371_v49 = vand.u32 4294901760, %v2268_v13  ;;  %v2294_v53 = vsub.f32 %v2129_v22, %v2162_v31  ;;  %v2297_v54 = vand.u32 4294901760, %v2262_v7 }
  0x11   :  { %3519 = vst [vmem:[#allocation9_spill] sm:$0xff] %v2285_v20  ;;  %92 = vmatpush1.msra.mxu0 %v2177_v37  ;;  %208 = vmatpush1.msra.mxu1 %v207_v8  ;;  %v224_v55 = vsub.f32 %v2254_v1, %v3369_v43  ;;  %v3373_v58 = vand.u32 4294901760, %v2282_v44  ;;  %v2311_v22 = vsub.f32 %v2147_v27, %v2168_v33  ;;  %v2314_v59 = vand.u32 4294901760, %v2276_v15  ;;  %v2328_v27 = vld [vmem:[%s3363_s1 + $0x40] sm:$0xff] }
  0x12   :  { %3520 = vst [vmem:[#allocation10_spill] sm:$0xff] %v2297_v54  ;;  %94 = vmatprep.subr.mxu0 %v2193_v42  ;;  %214 = vmatprep.subr.mxu1 %v213_v39  ;;  %v219_v63 = vand.u32 4294901760, %v218_v48  ;;  %v230_v0 = vsub.f32 %v2268_v13, %v3371_v49  ;;  %v3376_v8 = vand.u32 4294901760, %v2294_v53  ;;  %v2323_v43 = vsub.f32 %v2152_v28, %v2177_v37  ;;  %v2341_v28 = vld [vmem:[%s3363_s1 + $0x38] sm:$0xff] }
  0x13   :  { %3521 = vst [vmem:[#allocation11_spill] sm:$0xff] %v2314_v59  ;;  %96 = vmatpush1.msra.mxu0 %v2217_v51  ;;  %v225_v9 = vand.u32 4294901760, %v224_v55  ;;  %v236_v39 = vsub.f32 %v2282_v44, %v3373_v58  ;;  %v3378_v48 = vand.u32 4294901760, %v2311_v22  ;;  %v2336_v49 = vand.u32 4294901760, %v2302_v21 }
  0x14   :  { %220 = vmatpush1.msra.mxu1 %v219_v63  ;;  %98 = vmatprep.subr.mxu0 %v2242_v61  ;;  %v231_v56 = vand.u32 4294901760, %v230_v0  ;;  %v242_v55 = vsub.f32 %v2294_v53, %v3376_v8  ;;  %v3381_v58 = vand.u32 4294901760, %v2323_v43  ;;  %v2350_v50 = vsub.f32 %v2157_v29, %v2193_v42 }
  0x15   :  { %3522 = vst [vmem:[#allocation12_spill] sm:$0xff] %v2336_v49  ;;  %226 = vmatprep.subr.mxu1 %v225_v9  ;;  %100 = vmatpush1.msra.mxu0 %v2257_v2  ;;  %v237_v63 = vand.u32 4294901760, %v236_v39  ;;  %v248_v0 = vsub.f32 %v2311_v22, %v3378_v48  ;;  %v2362_v8 = vand.u32 4294901760, %v2328_v27  ;;  %v2366_v29 = vsub.f32 %v2182_v38, %v2217_v51  ;;  %v2384_v38 = vld [vmem:[%s3363_s1 + $0x20] sm:$0xff] }
  0x16   :  { %232 = vmatpush1.msra.mxu1 %v231_v56  ;;  %102 = vmatprep.subr.mxu0 %v2271_v14  ;;  %v243_v9 = vand.u32 4294901760, %v242_v55  ;;  %v254_v39 = vsub.f32 %v2323_v43, %v3381_v58  ;;  %v3387_v48 = vand.u32 4294901760, %v2350_v50  ;;  %v2379_v35 = vand.u32 4294901760, %v2341_v28 }
  0x17   :  { %3523 = vst [vmem:[#allocation13_spill] sm:$0xff] %v2362_v8  ;;  %238 = vmatprep.subr.mxu1 %v237_v63  ;;  %104 = vmatpush1.msra.mxu0 %v2285_v20  ;;  %v249_v56 = vand.u32 4294901760, %v248_v0  ;;  %v3388_v55 = vand.u32 4294901760, %v2366_v29  ;;  %v2390_v34 = vsub.f32 %v2209_v47, %v2242_v61  ;;  %v2393_v58 = vand.u32 4294901760, %v2355_v45 }
  0x18   :  { %244 = vmatpush1.msra.mxu1 %v243_v9  ;;  %106 = vmatprep.subr.mxu0 %v2297_v54  ;;  %v255_v63 = vand.u32 4294901760, %v254_v39  ;;  %v260_v0 = vsub.f32 %v2350_v50, %v3387_v48  ;;  %v2406_v47 = vsub.f32 %v2222_v52, %v2257_v2  ;;  %v2409_v3 = vand.u32 4294901760, %v2371_v40  ;;  %v2426_v52 = vld [vmem:[%s3363_s1 + $0x10] sm:$0xff] }
  0x19   :  { %3524 = vst [vmem:[#allocation14_spill] sm:$0xff] %v2393_v58  ;;  %250 = vmatprep.subr.mxu1 %v249_v56  ;;  %108 = vmatpush1.msra.mxu0 %v2314_v59  ;;  %v266_v9 = vsub.f32 %v2366_v29, %v3388_v55  ;;  %v2418_v61 = vsub.f32 %v2232_v57, %v2271_v14  ;;  %v2421_v48 = vand.u32 4294901760, %v2384_v38  ;;  %v2435_v57 = vand.u32 4294901760, %v2398_v30  ;;  %v2440_v14 = vld [vmem:[%s3363_s1 + $0x8] sm:$0xff] }
  0x1a   :  { %3525 = vst [vmem:[#allocation15_spill] sm:$0xff] %v2409_v3  ;;  %256 = vmatpush1.msra.mxu1 %v255_v63  ;;  %110 = vmatprep.subr.mxu0 %v2336_v49  ;;  %v261_v56 = vand.u32 4294901760, %v260_v0  ;;  %v2432_v39 = vsub.f32 %v2247_v62, %v2285_v20  ;;  %v3527_v2 = vand.u32 4294901760, %v2390_v34  ;;  %v2449_v62 = vsub.f32 %v2262_v7, %v2297_v54  ;;  %v2466_v7 = vld [vmem:[%s3363_s1] sm:$0xff] }
  0x1b   :  { %3526 = vst [vmem:[#allocation16_spill] sm:$0xff] %v2421_v48  ;;  %112 = vmatpush1.msra.mxu0 %v2362_v8  ;;  %v267_v63 = vand.u32 4294901760, %v266_v9  ;;  %v3405_v55 = vand.u32 4294901760, %v2418_v61  ;;  %v3529_v20 = vand.u32 4294901760, %v2406_v47  ;;  %v2457_v9 = vand.u32 4294901760, %v2426_v52 }
  0x1c   :  { %v272_v0 = vsub.f32 %v2390_v34, %v3527_v2  ;;  %3528 = vst [vmem:[#allocation17_spill] sm:$0xff] %v2449_v62  ;;  %262 = vmatprep.subr.mxu1 %v261_v56  ;;  %114 = vmatprep.subr.mxu0 %v2379_v35  ;;  %v2461_v2 = vsub.f32 %v2276_v15, %v2314_v59  ;;  %v2474_v54 = vand.u32 4294901760, %v2440_v14  ;;  %v3531_v59 = vand.u32 4294901760, %v2432_v39 }
  0x1d   :  { %v278_v51 = vsub.f32 %v2406_v47, %v3529_v20  ;;  %3530 = vst [vmem:[#allocation18_spill] sm:$0xff] %v2457_v9  ;;  %268 = vmatpush1.msra.mxu1 %v267_v63  ;;  %116 = vmatpush1.msra.mxu0 %v2393_v58  ;;  %v284_v20 = vsub.f32 %v2418_v61, %v3405_v55  ;;  %v20_v55 = vld [vmem:[%s3364_s0] sm:$0x1] }
  0x1e   :  { %v273_v56 = vand.u32 4294901760, %v272_v0  ;;  %118 = vmatprep.subr.mxu0 %v2409_v3  ;;  %v290_v37 = vsub.f32 %v2432_v39, %v3531_v59  ;;  %v2483_v0 = vsub.f32 %v2302_v21, %v2336_v49  ;;  %v2493_v59 = vand.u32 4294901760, %v2466_v7 }
  0x1f   :  { %v279_v15 = vand.u32 4294901760, %v278_v51  ;;  %v285_v42 = vand.u32 4294901760, %v284_v20  ;;  %120 = vmatpush1.msra.mxu0 %v2421_v48  ;;  %v3532_v51 = vand.u32 4294901760, %v2449_v62  ;;  %v2497_v63 = vsub.f32 %v2328_v27, %v2362_v8 }
  0x20   :  { %274 = vmatprep.subr.mxu1 %v273_v56  ;;  %v291_v21 = vand.u32 4294901760, %v290_v37  ;;  %122 = vmatprep.subr.mxu0 %v2435_v57  ;;  %v3533_v56 = vand.u32 4294901760, %v2461_v2  ;;  %v3412_v49 = vand.u32 4294901760, %v2483_v0  ;;  %v2514_v37 = vsub.f32 %v2355_v45, %v2393_v58 }
  0x21   :  { %v296_v33 = vsub.f32 %v2449_v62, %v3532_v51  ;;  %280 = vmatpush1.msra.mxu1 %v279_v15  ;;  %v2506_v51 = vsub.f32 %v2341_v28, %v2379_v35  ;;  %124 = vmatpush1.msra.mxu0 %v2457_v9  ;;  %v3415_v27 = vand.u32 4294901760, %v2497_v63  ;;  %v2510_v15 = vand.u32 4294901760, %v20_v55 }
  0x22   :  { %v302_v20 = vsub.f32 %v2461_v2, %v3533_v56  ;;  %286 = vmatprep.subr.mxu1 %v285_v42  ;;  %126 = vmatprep.subr.mxu0 %v2474_v54  ;;  %v308_v28 = vsub.f32 %v2483_v0, %v3412_v49  ;;  %v2523_v42 = vsub.f32 %v2371_v40, %v2409_v3 }
  0x23   :  { %v297_v62 = vand.u32 4294901760, %v296_v33  ;;  %3534 = vst [vmem:[#allocation19_spill] sm:$0xff] %v2510_v15  ;;  %292 = vmatpush1.msra.mxu1 %v291_v21  ;;  %128 = vmatpush1.msra.mxu0 %v2493_v59  ;;  %v314_v45 = vsub.f32 %v2497_v63, %v3415_v27  ;;  %v2530_v21 = vsub.f32 %v20_v55, %v2510_v15  ;;  %v3535_v40 = vand.u32 4294901760, %v2506_v51 }
  0x24   :  { %v303_v56 = vand.u32 4294901760, %v302_v20  ;;  %v2535_v49 = vsub.f32 %v2384_v38, %v2421_v48  ;;  %v309_v33 = vand.u32 4294901760, %v308_v28  ;;  %407 = vmatprep.subr.mxu0 %v2114_v19  ;;  %v3420_v3 = vand.u32 4294901760, %v2523_v42 }
  0x25   :  { %298 = vmatprep.subr.mxu1 %v297_v62  ;;  %v320_v62 = vsub.f32 %v2506_v51, %v3535_v40  ;;  %v2544_v55 = vsub.f32 %v2398_v30, %v2435_v57  ;;  %v315_v27 = vand.u32 4294901760, %v314_v45  ;;  %v3421_v20 = vand.u32 4294901760, %v2530_v21 }
  0x26   :  { %304 = vmatpush1.msra.mxu1 %v303_v56  ;;  %v3536_v38 = vand.u32 4294901760, %v2514_v37  ;;  %v3424_v28 = vand.u32 4294901760, %v2535_v49  ;;  %v332_v40 = vsub.f32 %v2523_v42, %v3420_v3  ;;  %v2557_v30 = vsub.f32 %v2426_v52, %v2457_v9 }
  0x27   :  { %310 = vmatprep.subr.mxu1 %v309_v33  ;;  %v321_v48 = vand.u32 4294901760, %v320_v62  ;;  %v3428_v58 = vand.u32 4294901760, %v2544_v55  ;;  %v165_v45 = vsub.f32 %v2530_v21, %v3421_v20  ;;  %v2567_v62 = vsub.f32 %v2440_v14, %v2474_v54 }
  0x28   :  { %v326_v56 = vsub.f32 %v2514_v37, %v3536_v38  ;;  %3537 = vst [vmem:[#allocation20_spill] sm:$0xff] %v2557_v30  ;;  %316 = vmatpush1.msra.mxu1 %v315_v27  ;;  %v338_v33 = vsub.f32 %v2535_v49, %v3424_v28  ;;  %v333_v3 = vand.u32 4294901760, %v332_v40  ;;  %v3427_v27 = vand.u32 4294901760, %v2557_v30 }
  0x29   :  { %322 = vmatprep.subr.mxu1 %v321_v48  ;;  %v344_v52 = vsub.f32 %v2544_v55, %v3428_v58  ;;  %v2575_v20 = vsub.f32 %v2466_v7, %v2493_v59  ;;  %v3426_v28 = vand.u32 4294901760, %v2567_v62  ;;  %v3552_v58 = vand.u32 4294901760, %v2114_v19 }
  0x2a   :  { %v327_v38 = vand.u32 4294901760, %v326_v56  ;;  %v166_v56 = vand.u32 4294901760, %v165_v45  ;;  %v339_v9 = vand.u32 4294901760, %v338_v33  ;;  %v350_v48 = vsub.f32 %v2557_v30, %v3427_v27  ;;  %v3551_v27 = vld [vmem:[#allocation12_spill] sm:$0xff] }
  0x2b   :  { %3538 = vst [vmem:[#allocation21_spill] sm:$0xff] %v2575_v20  ;;  %v345_v14 = vand.u32 4294901760, %v344_v52  ;;  %v3425_v40 = vand.u32 4294901760, %v2575_v20  ;;  %v356_v7 = vsub.f32 %v2567_v62, %v3426_v28  ;;  %v3539_v33 = vmov 0.0   ;;  %v3540_v52 = vld [vmem:[#allocation2_spill] sm:$0xff]  ;;  %v3550_v28 = vld [vmem:[#allocation11_spill] sm:$0xff] }
  0x2c   :  { %328 = vmatpush1.msra.mxu1 %v327_v38  ;;  %167 = vmatmul.mubr.f32.vlgmr.msra.gmra.mxu0 %v166_v56  ;;  %v351_v45 = vand.u32 4294901760, %v350_v48  ;;  %v3541_v56 = vld [vmem:[#allocation17_spill] sm:$0xff]  ;;  %v3543_v48 = vld [vmem:[#allocation4_spill] sm:$0xff]  ;;  %v3559_v19 = vand.u32 4294901760, %v2174_v36 }
  0x2d   :  { %334 = vmatprep.subr.mxu1 %v333_v3  ;;  %410 = vmatpush1.msra.mxu0 %v2136_v24  ;;  %v362_v3 = vsub.f32 %v2575_v20, %v3425_v40  ;;  %v357_v38 = vand.u32 4294901760, %v356_v7  ;;  %v3544_v7 = vld [vmem:[#allocation5_spill] sm:$0xff]  ;;  %v3549_v40 = vld [vmem:[#allocation10_spill] sm:$0xff] }
  0x2e   :  { %340 = vmatpush1.msra.mxu1 %v339_v9  ;;  %413 = vmatprep.subr.mxu0 %v2142_v26 }
  0x2f   :  { %346 = vmatprep.subr.mxu1 %v345_v14  ;;  %533 = vmatprep.mubr.f32.mxu0 %v3539_v33  ;;  %v363_v9 = vand.u32 4294901760, %v362_v3  ;;  %v3542_v14 = vld [vmem:[#allocation3_spill] sm:$0xff] }
  0x30   :  { %416 = vmatpush1.msra.mxu0 %v2165_v32  ;;  %352 = vmatpush1.msra.mxu1 %v351_v45  ;;  %v3545_v45 = vld [vmem:[#allocation6_spill] sm:$0xff]  ;;  %v3546_v3 = vld [vmem:[#allocation7_spill] sm:$0xff] }
  0x31   :  { %419 = vmatprep.subr.mxu0 %v2174_v36  ;;  %358 = vmatprep.subr.mxu1 %v357_v38  ;;  %v3547_v38 = vld [vmem:[#allocation8_spill] sm:$0xff]  ;;  %v3564_v36 = vand.u32 4294901760, %v2530_v21 }
  0x32   :  { %422 = vmatpush1.msra.mxu0 %v2190_v41  ;;  %364 = vmatpush1.msra.mxu1 %v363_v9  ;;  %v3548_v9 = vld [vmem:[#allocation9_spill] sm:$0xff] }
  0x33   :  { %425 = vmatprep.subr.mxu0 %v2204_v46  ;;  %399 = vmatmul.mubr.f32.vlgmr.msra.gmra.mxu1 %v2510_v15  ;;  %v3553_v15 = vld [vmem:[#allocation14_spill] sm:$0xff] }
  0x34   :  { %428 = vmatpush1.msra.mxu0 %v2239_v60  ;;  %543 = vmatprep.subr.mxu1 %v2076_v4 }
  0x35   :  { %431 = vmatprep.subr.mxu0 %v2254_v1  ;;  %545 = vmatpush1.msra.mxu1 %v2078_v5 }
  0x36   :  { %434 = vmatpush1.msra.mxu0 %v2268_v13  ;;  %547 = vmatprep.subr.mxu1 %v2080_v6 }
  0x37   :  { %437 = vmatprep.subr.mxu0 %v2282_v44  ;;  %549 = vmatpush1.msra.mxu1 %v2091_v10 }
  0x38   :  { %440 = vmatpush1.msra.mxu0 %v2294_v53  ;;  %551 = vmatprep.subr.mxu1 %v2093_v11 }
  0x39   :  { %443 = vmatprep.subr.mxu0 %v2311_v22  ;;  %553 = vmatpush1.msra.mxu1 %v2095_v12 }
  0x3a   :  { %446 = vmatpush1.msra.mxu0 %v2323_v43  ;;  %555 = vmatprep.subr.mxu1 %v2107_v16 }
  0x3b   :  { %449 = vmatprep.subr.mxu0 %v2350_v50  ;;  %557 = vmatpush1.msra.mxu1 %v2109_v17 }
  0x3c   :  { %452 = vmatpush1.msra.mxu0 %v2366_v29  ;;  %559 = vmatprep.subr.mxu1 %v2111_v18 }
  0x3d   :  { %455 = vmatprep.subr.mxu0 %v2390_v34  ;;  %561 = vmatpush1.msra.mxu1 %v2133_v23 }
  0x3e   :  { %458 = vmatpush1.msra.mxu0 %v2406_v47  ;;  %563 = vmatprep.subr.mxu1 %v2139_v25 }
  0x3f   :  { %461 = vmatprep.subr.mxu0 %v2418_v61  ;;  %565 = vmatpush1.msra.mxu1 %v2162_v31 }
  0x40   :  { %464 = vmatpush1.msra.mxu0 %v2432_v39  ;;  %567 = vmatprep.subr.mxu1 %v3540_v52 }
  0x41   :  { %467 = vmatprep.subr.mxu0 %v3541_v56  ;;  %569 = vmatpush1.msra.mxu1 %v3542_v14 }
  0x42   :  { %470 = vmatpush1.msra.mxu0 %v2461_v2  ;;  %571 = vmatprep.subr.mxu1 %v3543_v48 }
  0x43   :  { %473 = vmatprep.subr.mxu0 %v2483_v0  ;;  %573 = vmatpush1.msra.mxu1 %v3544_v7 }
  0x44   :  { %476 = vmatpush1.msra.mxu0 %v2497_v63  ;;  %575 = vmatprep.subr.mxu1 %v3545_v45 }
  0x45   :  { %479 = vmatprep.subr.mxu0 %v2506_v51  ;;  %577 = vmatpush1.msra.mxu1 %v3546_v3 }
  0x46   :  { %482 = vmatpush1.msra.mxu0 %v2514_v37  ;;  %579 = vmatprep.subr.mxu1 %v3547_v38 }
  0x47   :  { %485 = vmatprep.subr.mxu0 %v2523_v42  ;;  %581 = vmatpush1.msra.mxu1 %v3548_v9 }
  0x48   :  { %488 = vmatpush1.msra.mxu0 %v2535_v49  ;;  %583 = vmatprep.subr.mxu1 %v3549_v40 }
  0x49   :  { %491 = vmatprep.subr.mxu0 %v2544_v55  ;;  %585 = vmatpush1.msra.mxu1 %v3550_v28  ;;  %v3554_v28 = vand.u32 4294901760, %v2136_v24  ;;  %v3561_v24 = vand.u32 4294901760, %v2190_v41  ;;  %v3566_v41 = vand.u32 4294901760, %v2268_v13  ;;  %v3585_v13 = vand.u32 4294901760, %v2544_v55 }
  0x4a   :  { %494 = vmatpush1.msra.mxu0 %v2557_v30  ;;  %587 = vmatprep.subr.mxu1 %v3551_v27  ;;  %v3555_v30 = vld [vmem:[#allocation15_spill] sm:$0xff]  ;;  %v3556_v27 = vand.u32 4294901760, %v2142_v26  ;;  %v3562_v26 = vand.u32 4294901760, %v2204_v46  ;;  %v3567_v46 = vand.u32 4294901760, %v2282_v44 }
  0x4b   :  { %497 = vmatprep.subr.mxu0 %v2567_v62  ;;  %589 = vmatpush1.msra.mxu1 %v2362_v8  ;;  %v3557_v8 = vld [vmem:[#allocation16_spill] sm:$0xff] }
  0x4c   :  { %500 = vmatpush1.msra.mxu0 %v2575_v20  ;;  %591 = vmatprep.subr.mxu1 %v2379_v35  ;;  %v3558_v20 = vand.u32 4294901760, %v2165_v32  ;;  %v3563_v32 = vand.u32 4294901760, %v2239_v60  ;;  %v3568_v60 = vand.u32 4294901760, %v2294_v53  ;;  %v3588_v53 = vld [vmem:[#allocation11_spill] sm:$0xff] }
  0x4d   :  { %536 = vmatmul.mubr.f32.vlgmr.msra.gmra.mxu0 %v2530_v21  ;;  %651 = vmatprep.subr.mxu0 %v3552_v58  ;;  %v3560_v58 = vld [vmem:[#allocation18_spill] sm:$0xff] }
  0x4e   :  { %593 = vmatpush1.msra.mxu1 %v3553_v15  ;;  %655 = vmatpush1.msra.mxu0 %v3554_v28 }
  0x4f   :  { %595 = vmatprep.subr.mxu1 %v3555_v30  ;;  %659 = vmatprep.subr.mxu0 %v3556_v27 }
  0x50   :  { %597 = vmatpush1.msra.mxu1 %v3557_v8  ;;  %663 = vmatpush1.msra.mxu0 %v3558_v20  ;;  %v3565_v20 = vand.u32 4294901760, %v2254_v1  ;;  %v3569_v1 = vand.u32 4294901760, %v2311_v22  ;;  %v3589_v22 = vand.u32 4294901760, %v2567_v62  ;;  %v934_v62 = vld [vmem:[%s3365_s3 + $0x60] sm:$0xff] }
  0x51   :  { %599 = vmatprep.subr.mxu1 %v2435_v57  ;;  %667 = vmatprep.subr.mxu0 %v3559_v19 }
  0x52   :  { %601 = vmatpush1.msra.mxu1 %v3560_v58  ;;  %671 = vmatpush1.msra.mxu0 %v3561_v24 }
  0x53   :  { %603 = vmatprep.subr.mxu1 %v2474_v54  ;;  %675 = vmatprep.subr.mxu0 %v3562_v26 }
  0x54   :  { %605 = vmatpush1.msra.mxu1 %v2493_v59  ;;  %638 = vmatprep.mubr.f32.mxu1 %v3539_v33 }
  0x55   :  { %679 = vmatpush1.msra.mxu0 %v3563_v32  ;;  %642 = vmatmul.mubr.f32.vlgmr.msra.gmra.mxu1 %v3564_v36  ;;  %v949_v32 = vld [vmem:[%s3365_s3 + $0xd8] sm:$0xff] }
  0x56   :  { %683 = vmatprep.subr.mxu0 %v3565_v20  ;;  %817 = vmatprep.subr.mxu1 %v2076_v4  ;;  %v3570_v4 = vand.u32 4294901760, %v2323_v43  ;;  %v3586_v43 = vld [vmem:[#allocation20_spill] sm:$0xff] }
  0x57   :  { %687 = vmatpush1.msra.mxu0 %v3566_v41  ;;  %819 = vmatpush1.msra.mxu1 %v2078_v5  ;;  %v3571_v5 = vand.u32 4294901760, %v2350_v50  ;;  %v3583_v50 = vand.u32 4294901760, %v2523_v42  ;;  %v3587_v44 = vand.u32 4294901760, %v3586_v43 }
  0x58   :  { %691 = vmatprep.subr.mxu0 %v3567_v46  ;;  %821 = vmatprep.subr.mxu1 %v2080_v6  ;;  %v3572_v6 = vand.u32 4294901760, %v2366_v29  ;;  %v3590_v29 = vld [vmem:[#allocation12_spill] sm:$0xff] }
  0x59   :  { %695 = vmatpush1.msra.mxu0 %v3568_v60  ;;  %823 = vmatpush1.msra.mxu1 %v2091_v10  ;;  %v3573_v10 = vand.u32 4294901760, %v2390_v34  ;;  %v3582_v34 = vand.u32 4294901760, %v2514_v37  ;;  %v935_v37 = vld [vmem:[%s3365_s3 + $0x68] sm:$0xff]  ;;  %v933_v60 = vld [vmem:[%s3365_s3 + $0x58] sm:$0xff] }
  0x5a   :  { %699 = vmatprep.subr.mxu0 %v3569_v1  ;;  %825 = vmatprep.subr.mxu1 %v2093_v11  ;;  %v3574_v11 = vand.u32 4294901760, %v2406_v47  ;;  %v3591_v47 = vld [vmem:[#allocation21_spill] sm:$0xff]  ;;  %v2792_v28 = vand.u32 4294901760, %v935_v37 }
  0x5b   :  { %703 = vmatpush1.msra.mxu0 %v3570_v4  ;;  %827 = vmatpush1.msra.mxu1 %v2095_v12  ;;  %v3575_v12 = vand.u32 4294901760, %v2418_v61  ;;  %v3584_v61 = vand.u32 4294901760, %v2535_v49  ;;  %v3592_v49 = vand.u32 4294901760, %v3591_v47 }
  0x5c   :  { %707 = vmatprep.subr.mxu0 %v3571_v5  ;;  %829 = vmatprep.subr.mxu1 %v2107_v16  ;;  %v3576_v16 = vand.u32 4294901760, %v2432_v39  ;;  %v3593_v39 = vld [vmem:[#allocation13_spill] sm:$0xff] }
  0x5d   :  { %711 = vmatpush1.msra.mxu0 %v3572_v6  ;;  %831 = vmatpush1.msra.mxu1 %v2109_v17  ;;  %v3577_v17 = vand.u32 4294901760, %v3541_v56 }
  0x5e   :  { %715 = vmatprep.subr.mxu0 %v3573_v10  ;;  %833 = vmatprep.subr.mxu1 %v2111_v18  ;;  %v3578_v18 = vand.u32 4294901760, %v2461_v2  ;;  %v3594_v2 = vld [vmem:[#allocation19_spill] sm:$0xff]  ;;  %v948_v10 = vld [vmem:[%s3365_s3 + $0xd0] sm:$0xff] }
  0x5f   :  { %719 = vmatpush1.msra.mxu0 %v3574_v11  ;;  %835 = vmatpush1.msra.mxu1 %v2133_v23  ;;  %v3579_v23 = vand.u32 4294901760, %v2483_v0 }
  0x60   :  { %723 = vmatprep.subr.mxu0 %v3575_v12  ;;  %837 = vmatprep.subr.mxu1 %v2139_v25  ;;  %v3580_v25 = vand.u32 4294901760, %v2497_v63 }
  0x61   :  { %727 = vmatpush1.msra.mxu0 %v3576_v16  ;;  %839 = vmatpush1.msra.mxu1 %v2162_v31  ;;  %v3581_v31 = vand.u32 4294901760, %v2506_v51  ;;  %v936_v51 = vld [vmem:[%s3365_s3 + $0x70] sm:$0xff] }
  0x62   :  { %731 = vmatprep.subr.mxu0 %v3577_v17  ;;  %841 = vmatprep.subr.mxu1 %v3540_v52  ;;  %v2788_v21 = vand.u32 4294901760, %v936_v51  ;;  %v2807_v52 = vand.u32 4294901760, %v934_v62  ;;  %v2870_v17 = vand.u32 4294901760, %v949_v32 }
  0x63   :  { %735 = vmatpush1.msra.mxu0 %v3578_v18  ;;  %843 = vmatpush1.msra.mxu1 %v3542_v14  ;;  %v932_v18 = vld [vmem:[%s3365_s3 + $0x50] sm:$0xff] }
  0x64   :  { %739 = vmatprep.subr.mxu0 %v3579_v23  ;;  %845 = vmatprep.subr.mxu1 %v3543_v48  ;;  %v2812_v14 = vsub.f32 %v936_v51, %v2788_v21  ;;  %v947_v23 = vld [vmem:[%s3365_s3 + $0xc8] sm:$0xff]  ;;  %v2895_v47 = vand.u32 4294901760, %v932_v18 }
  0x65   :  { %743 = vmatpush1.msra.mxu0 %v3580_v25  ;;  %847 = vmatpush1.msra.mxu1 %v3544_v7  ;;  %v2818_v7 = vsub.f32 %v935_v37, %v2792_v28  ;;  %v931_v25 = vld [vmem:[%s3365_s3 + $0x48] sm:$0xff] }
  0x66   :  { %747 = vmatprep.subr.mxu0 %v3581_v31  ;;  %849 = vmatprep.subr.mxu1 %v3545_v45 }
  0x67   :  { %751 = vmatpush1.msra.mxu0 %v3582_v34  ;;  %851 = vmatpush1.msra.mxu1 %v3546_v3  ;;  %v3445_v26 = vand.u32 4294901760, %v2818_v7 }
  0x68   :  { %755 = vmatprep.subr.mxu0 %v3583_v50  ;;  %853 = vmatprep.subr.mxu1 %v3547_v38 }
  0x69   :  { %759 = vmatpush1.msra.mxu0 %v3584_v61  ;;  %855 = vmatpush1.msra.mxu1 %v3548_v9  ;;  %v2829_v9 = vsub.f32 %v934_v62, %v2807_v52  ;;  %v1085_v6 = vsub.f32 %v2818_v7, %v3445_v26  ;;  %v2881_v61 = vand.u32 4294901760, %v933_v60 }
  0x6a   :  { %763 = vmatprep.subr.mxu0 %v3585_v13  ;;  %857 = vmatprep.subr.mxu1 %v3549_v40  ;;  %v946_v13 = vld [vmem:[%s3365_s3 + $0xc0] sm:$0xff] }
  0x6b   :  { %767 = vmatpush1.msra.mxu0 %v3587_v44  ;;  %859 = vmatpush1.msra.mxu1 %v3588_v53  ;;  %v3442_v46 = vand.u32 4294901760, %v2829_v9  ;;  %v1086_v50 = vand.u32 4294901760, %v1085_v6  ;;  %v2887_v53 = vsub.f32 %v949_v32, %v2870_v17 }
  0x6c   :  { %771 = vmatprep.subr.mxu0 %v3589_v22  ;;  %861 = vmatprep.subr.mxu1 %v3590_v29  ;;  %v2889_v22 = vand.u32 4294901760, %v948_v10  ;;  %v2893_v29 = vsub.f32 %v933_v60, %v2881_v61 }
  0x6d   :  { %775 = vmatpush1.msra.mxu0 %v3592_v49  ;;  %808 = vmatprep.mubr.f32.mxu0 %v3539_v33  ;;  %v1092_v16 = vsub.f32 %v2829_v9, %v3442_v46  ;;  %v2897_v49 = vand.u32 4294901760, %v947_v23 }
  0x6e   :  { %863 = vmatpush1.msra.mxu1 %v3593_v39  ;;  %810 = vmatmul.mubr.f32.vlgmr.msra.gmra.mxu0 %v3594_v2  ;;  %v2899_v39 = vand.u32 4294901760, %v931_v25  ;;  %v3439_v51 = vand.u32 4294901760, %v2893_v29 }
  0x6f   :  { %865 = vmatprep.subr.mxu1 %v2379_v35  ;;  %912 = vmatprep.mubr.f32.mxu1 %v3539_v33  ;;  %v953_v35 = vld [vmem:[%s3365_s3 + $0xf8] sm:$0xff]  ;;  %v1093_v44 = vand.u32 4294901760, %v1092_v16  ;;  %v2917_v37 = vsub.f32 %v947_v23, %v2897_v49 }
  0x70   :  { %867 = vmatpush1.msra.mxu1 %v3553_v15  ;;  %v2760_v63 = vand.u32 4294901760, %v953_v35  ;;  %v951_v15 = vld [vmem:[%s3365_s3 + $0xe8] sm:$0xff] }
  0x71   :  { %869 = vmatprep.subr.mxu1 %v3555_v30  ;;  %v2790_v55 = vand.u32 4294901760, %v951_v15  ;;  %v950_v30 = vld [vmem:[%s3365_s3 + $0xe0] sm:$0xff]  ;;  %v3436_v60 = vand.u32 4294901760, %v2917_v37 }
  0x72   :  { %871 = vmatpush1.msra.mxu1 %v3557_v8  ;;  %3595 = vst [vmem:[#allocation2_spill] sm:$0xff] %v2760_v63  ;;  %v937_v8 = vld [vmem:[%s3365_s3 + $0x78] sm:$0xff]  ;;  %1823 = vmatprep.subr.mxu0 %v2760_v63  ;;  %v2805_v33 = vand.u32 4294901760, %v950_v30 }
  0x73   :  { %873 = vmatprep.subr.mxu1 %v2435_v57  ;;  %v2765_v0 = vand.u32 4294901760, %v937_v8  ;;  %v2771_v57 = vsub.f32 %v953_v35, %v2760_v63  ;;  %v2815_v48 = vsub.f32 %v951_v15, %v2790_v55  ;;  %v2904_v35 = vsub.f32 %v948_v10, %v2889_v22 }
  0x74   :  { %875 = vmatpush1.msra.mxu1 %v3560_v58  ;;  %v2826_v38 = vsub.f32 %v950_v30, %v2805_v33  ;;  %v3448_v58 = vand.u32 4294901760, %v2812_v14  ;;  %v2914_v15 = vsub.f32 %v932_v18, %v2895_v47  ;;  %v2920_v30 = vsub.f32 %v931_v25, %v2899_v39 }
  0x75   :  { %877 = vmatprep.subr.mxu1 %v2474_v54  ;;  %v952_v54 = vld [vmem:[%s3365_s3 + $0xf0] sm:$0xff]  ;;  %3596 = vst [vmem:[#allocation17_spill] sm:$0xff] %v2771_v57  ;;  %v2786_v42 = vsub.f32 %v937_v8, %v2765_v0  ;;  %1824 = vmatpush3.msra.mxu0 %v2765_v0  ;;  %v3453_v27 = vand.u32 4294901760, %v2771_v57  ;;  %v3447_v24 = vand.u32 4294901760, %v2815_v48  ;;  %v2906_v8 = vand.u32 4294901760, %v946_v13 }
  0x76   :  { %879 = vmatpush1.msra.mxu1 %v2493_v59  ;;  %v2773_v59 = vand.u32 4294901760, %v952_v54  ;;  %v3444_v41 = vand.u32 4294901760, %v2826_v38  ;;  %v1078_v4 = vsub.f32 %v2812_v14, %v3448_v58  ;;  %v1225_v23 = vsub.f32 %v2917_v37, %v3436_v60 }
  0x77   :  { %914 = vmatmul.mubr.f32.vlgmr.msra.gmra.mxu1 %v3594_v2  ;;  %v3452_v56 = vand.u32 4294901760, %v2786_v42  ;;  %v1183_v45 = vsub.f32 %v2771_v57, %v3453_v27  ;;  %v1197_v5 = vsub.f32 %v2815_v48, %v3447_v24  ;;  %v3441_v2 = vand.u32 4294901760, %v2887_v53  ;;  %v925_v24 = vld [vmem:[%s3365_s3 + $0x18] sm:$0xff] }
  0x78   :  { %v2803_v40 = vsub.f32 %v952_v54, %v2773_v59  ;;  %1825 = vmatprep.subr.mxu0 %v2773_v59  ;;  %v1204_v12 = vsub.f32 %v2826_v38, %v3444_v41  ;;  %v1079_v31 = vand.u32 4294901760, %v1078_v4  ;;  %v930_v54 = vld [vmem:[%s3365_s3 + $0x40] sm:$0xff]  ;;  %v945_v4 = vld [vmem:[%s3365_s3 + $0xb8] sm:$0xff] }
  0x79   :  { %1826 = vmatpush3.msra.mxu0 %v2788_v21  ;;  %v1071_v19 = vsub.f32 %v2786_v42, %v3452_v56  ;;  %v1184_v36 = vand.u32 4294901760, %v1183_v45  ;;  %v1198_v34 = vand.u32 4294901760, %v1197_v5  ;;  %v1211_v62 = vsub.f32 %v2887_v53, %v3441_v2  ;;  %v938_v56 = vld [vmem:[%s3365_s3 + $0x80] sm:$0xff] }
  0x7a   :  { %v3450_v3 = vand.u32 4294901760, %v2803_v40  ;;  %1827 = vmatprep.subr.mxu0 %v2790_v55  ;;  %v1205_v43 = vand.u32 4294901760, %v1204_v12  ;;  %v3438_v45 = vand.u32 4294901760, %v2904_v35  ;;  %v2930_v32 = vand.u32 4294901760, %v930_v54  ;;  %v929_v12 = vld [vmem:[%s3365_s3 + $0x38] sm:$0xff] }
  0x7b   :  { %1828 = vmatpush3.msra.mxu0 %v2792_v28  ;;  %v1072_v1 = vand.u32 4294901760, %v1071_v19  ;;  %1858 = vmatprep.subr.mxu1 %v1184_v36  ;;  %v2928_v19 = vsub.f32 %v946_v13, %v2906_v8  ;;  %v1099_v36 = vsub.f32 %v2893_v29, %v3439_v51  ;;  %v1212_v5 = vand.u32 4294901760, %v1211_v62  ;;  %v927_v62 = vld [vmem:[%s3365_s3 + $0x28] sm:$0xff] }
  0x7c   :  { %v1190_v20 = vsub.f32 %v2803_v40, %v3450_v3  ;;  %1829 = vmatprep.subr.mxu0 %v2805_v33  ;;  %v1218_v6 = vsub.f32 %v2904_v35, %v3438_v45  ;;  %v940_v3 = vld [vmem:[%s3365_s3 + $0x90] sm:$0xff] }
  0x7d   :  { %1830 = vmatpush3.msra.mxu0 %v2807_v52  ;;  %1859 = vmatpush3.msra.mxu1 %v1072_v1  ;;  %v3435_v1 = vand.u32 4294901760, %v2920_v30  ;;  %v3434_v10 = vand.u32 4294901760, %v2928_v19  ;;  %v1100_v16 = vand.u32 4294901760, %v1099_v36 }
  0x7e   :  { %v1191_v11 = vand.u32 4294901760, %v1190_v20  ;;  %1831 = vmatprep.subr.mxu0 %v2870_v17  ;;  %v3437_v20 = vand.u32 4294901760, %v2914_v15 }
  0x7f   :  { %1832 = vmatpush3.msra.mxu0 %v2881_v61  ;;  %v1113_v25 = vsub.f32 %v2920_v30, %v3435_v1  ;;  %v942_v1 = vld [vmem:[%s3365_s3 + $0xa0] sm:$0xff] }
  0x80   :  { %1860 = vmatprep.subr.mxu1 %v1191_v11  ;;  %1833 = vmatprep.subr.mxu0 %v2889_v22  ;;  %v2948_v11 = vsub.f32 %v930_v54, %v2930_v32  ;;  %v1106_v18 = vsub.f32 %v2914_v15, %v3437_v20  ;;  %v943_v54 = vld [vmem:[%s3365_s3 + $0xa8] sm:$0xff] }
  0x81   :  { %1861 = vmatpush3.msra.mxu1 %v1079_v31  ;;  %1834 = vmatpush3.msra.mxu0 %v2895_v47  ;;  %v944_v31 = vld [vmem:[%s3365_s3 + $0xb0] sm:$0xff] }
  0x82   :  { %1862 = vmatprep.subr.mxu1 %v1198_v34  ;;  %1835 = vmatprep.subr.mxu0 %v2897_v49  ;;  %v1219_v34 = vand.u32 4294901760, %v1218_v6  ;;  %v3440_v13 = vand.u32 4294901760, %v2948_v11  ;;  %v1107_v36 = vand.u32 4294901760, %v1106_v18  ;;  %v1114_v6 = vand.u32 4294901760, %v1113_v25 }
  0x83   :  { %1863 = vmatpush3.msra.mxu1 %v1086_v50  ;;  %1836 = vmatpush3.msra.mxu0 %v2899_v39  ;;  %v1232_v50 = vsub.f32 %v2928_v19, %v3434_v10  ;;  %v2982_v10 = vand.u32 4294901760, %v929_v12  ;;  %v2993_v51 = vand.u32 4294901760, %v944_v31  ;;  %v3003_v25 = vand.u32 4294901760, %v927_v62 }
  0x84   :  { %1864 = vmatprep.subr.mxu1 %v1205_v43  ;;  %1837 = vmatprep.subr.mxu0 %v2906_v8  ;;  %v2971_v43 = vand.u32 4294901760, %v945_v4  ;;  %v1120_v20 = vsub.f32 %v2948_v11, %v3440_v13 }
  0x85   :  { %1865 = vmatpush3.msra.mxu1 %v1093_v44  ;;  %1838 = vmatpush3.msra.mxu0 %v2930_v32  ;;  %v928_v44 = vld [vmem:[%s3365_s3 + $0x30] sm:$0xff]  ;;  %v1233_v60 = vand.u32 4294901760, %v1232_v50 }
  0x86   :  { %1866 = vmatprep.subr.mxu1 %v1212_v5  ;;  %v1226_v5 = vand.u32 4294901760, %v1225_v23  ;;  %v2991_v45 = vsub.f32 %v945_v4, %v2971_v43  ;;  %1839 = vmatprep.subr.mxu0 %v2971_v43  ;;  %v2999_v18 = vand.u32 4294901760, %v928_v44  ;;  %v3001_v23 = vand.u32 4294901760, %v943_v54 }
  0x87   :  { %1867 = vmatpush3.msra.mxu1 %v1100_v16  ;;  %v2997_v16 = vsub.f32 %v929_v12, %v2982_v10  ;;  %1840 = vmatpush3.msra.mxu0 %v2982_v10  ;;  %v1121_v4 = vand.u32 4294901760, %v1120_v20  ;;  %v3013_v12 = vand.u32 4294901760, %v942_v1  ;;  %v3024_v20 = vsub.f32 %v927_v62, %v3003_v25 }
  0x88   :  { %1868 = vmatprep.subr.mxu1 %v1219_v34  ;;  %3597 = vst [vmem:[#allocation3_spill] sm:$0xff] %v2991_v45  ;;  %v926_v34 = vld [vmem:[%s3365_s3 + $0x20] sm:$0xff]  ;;  %v3443_v50 = vand.u32 4294901760, %v2991_v45  ;;  %1841 = vmatprep.subr.mxu0 %v2993_v51  ;;  %v3018_v2 = vsub.f32 %v928_v44, %v2999_v18  ;;  %v3021_v46 = vsub.f32 %v943_v54, %v3001_v23 }
  0x89   :  { %1869 = vmatpush3.msra.mxu1 %v1107_v36  ;;  %3598 = vst [vmem:[#allocation4_spill] sm:$0xff] %v2997_v16  ;;  %v3011_v36 = vsub.f32 %v944_v31, %v2993_v51  ;;  %v3446_v13 = vand.u32 4294901760, %v2997_v16  ;;  %3602 = vst [vmem:[#allocation8_spill] sm:$0xff] %v3024_v20  ;;  %1842 = vmatpush3.msra.mxu0 %v2999_v18  ;;  %v3034_v44 = vand.u32 4294901760, %v926_v34 }
  0x8a   :  { %1870 = vmatprep.subr.mxu1 %v1226_v5  ;;  %3600 = vst [vmem:[#allocation6_spill] sm:$0xff] %v3018_v2  ;;  %3601 = vst [vmem:[#allocation7_spill] sm:$0xff] %v3021_v46  ;;  %v1239_v31 = vsub.f32 %v2991_v45, %v3443_v50  ;;  %1843 = vmatprep.subr.mxu0 %v3001_v23  ;;  %v3455_v62 = vand.u32 4294901760, %v3021_v46  ;;  %v3454_v50 = vand.u32 4294901760, %v3024_v20  ;;  %v3097_v45 = vand.u32 4294901760, %v940_v3 }
  0x8b   :  { %3599 = vst [vmem:[#allocation5_spill] sm:$0xff] %v3011_v36  ;;  %1871 = vmatpush3.msra.mxu1 %v1114_v6  ;;  %v3449_v5 = vand.u32 4294901760, %v3011_v36  ;;  %v3032_v6 = vsub.f32 %v942_v1, %v3013_v12  ;;  %v1127_v54 = vsub.f32 %v2997_v16, %v3446_v13  ;;  %v941_v1 = vld [vmem:[%s3365_s3 + $0x98] sm:$0xff]  ;;  %1844 = vmatpush3.msra.mxu0 %v3003_v25 }
  0x8c   :  { %1872 = vmatprep.subr.mxu1 %v1233_v60  ;;  %v3451_v60 = vand.u32 4294901760, %v3018_v2  ;;  %v1240_v41 = vand.u32 4294901760, %v1239_v31  ;;  %v3052_v13 = vsub.f32 %v926_v34, %v3034_v44  ;;  %1845 = vmatprep.subr.mxu0 %v3013_v12  ;;  %v1141_v34 = vsub.f32 %v3024_v20, %v3454_v50  ;;  %v924_v50 = vld [vmem:[%s3365_s3 + $0x10] sm:$0xff]  ;;  %3609 = vst [vmem:[#allocation18_spill] sm:$0xff] %v3097_v45 }
  0x8d   :  { %3603 = vst [vmem:[#allocation9_spill] sm:$0xff] %v3032_v6  ;;  %1873 = vmatpush3.msra.mxu1 %v1121_v4  ;;  %v1246_v4 = vsub.f32 %v3011_v36, %v3449_v5  ;;  %v3458_v26 = vand.u32 4294901760, %v3032_v6  ;;  %v1128_v58 = vand.u32 4294901760, %v1127_v54  ;;  %v1253_v5 = vsub.f32 %v3021_v46, %v3455_v62  ;;  %1846 = vmatpush3.msra.mxu0 %v3034_v44  ;;  %v939_v62 = vld [vmem:[%s3365_s3 + $0x88] sm:$0xff] }
  0x8e   :  { %3604 = vst [vmem:[#allocation10_spill] sm:$0xff] %v3052_v13  ;;  %v1134_v31 = vsub.f32 %v3018_v2, %v3451_v60  ;;  %1874 = vmatprep.subr.mxu1 %v1240_v41  ;;  %v3075_v27 = vand.u32 4294901760, %v941_v1  ;;  %v923_v41 = vld [vmem:[%s3365_s3 + $0x8] sm:$0xff]  ;;  %v3607_v2 = vand.u32 4294901760, %v3052_v13 }
  0x8f   :  { %v1247_v54 = vand.u32 4294901760, %v1246_v4  ;;  %v1260_v60 = vsub.f32 %v3032_v6, %v3458_v26  ;;  %1875 = vmatpush3.msra.mxu1 %v1128_v58  ;;  %v1254_v20 = vand.u32 4294901760, %v1253_v5  ;;  %v1142_v26 = vand.u32 4294901760, %v1141_v34 }
  0x90   :  { %3605 = vst [vmem:[#allocation14_spill] sm:$0xff] %v3075_v27  ;;  %v1135_v4 = vand.u32 4294901760, %v1134_v31  ;;  %v3086_v6 = vand.u32 4294901760, %v925_v24  ;;  %v1148_v36 = vsub.f32 %v3052_v13, %v3607_v2  ;;  %v3095_v16 = vsub.f32 %v941_v1, %v3075_v27  ;;  %1847 = vmatprep.subr.mxu0 %v3075_v27  ;;  %v922_v2 = vld [vmem:[%s3365_s3] sm:$0xff] }
  0x91   :  { %1876 = vmatprep.subr.mxu1 %v1247_v54  ;;  %v1261_v46 = vand.u32 4294901760, %v1260_v60  ;;  %v3103_v5 = vand.u32 4294901760, %v924_v50  ;;  %v3105_v31 = vand.u32 4294901760, %v939_v62  ;;  %v3107_v60 = vand.u32 4294901760, %v923_v41 }
  0x92   :  { %3606 = vst [vmem:[#allocation15_spill] sm:$0xff] %v3086_v6  ;;  %3608 = vst [vmem:[#allocation16_spill] sm:$0xff] %v3095_v16  ;;  %1877 = vmatpush3.msra.mxu1 %v1135_v4  ;;  %v3101_v58 = vsub.f32 %v925_v24, %v3086_v6  ;;  %1848 = vmatpush3.msra.mxu0 %v3086_v6  ;;  %v1149_v1 = vand.u32 4294901760, %v1148_v36  ;;  %v3475_v34 = vand.u32 4294901760, %v3095_v16  ;;  %v3117_v24 = vand.u32 4294901760, %v938_v56 }
  0x93   :  { %3611 = vst [vmem:[#allocation11_spill] sm:$0xff] %v3103_v5  ;;  %3612 = vst [vmem:[#allocation12_spill] sm:$0xff] %v3105_v31  ;;  %1878 = vmatprep.subr.mxu1 %v1254_v20  ;;  %v3115_v54 = vsub.f32 %v940_v3, %v3097_v45  ;;  %1849 = vmatprep.subr.mxu0 %v3097_v45  ;;  %v3122_v13 = vsub.f32 %v924_v50, %v3103_v5  ;;  %v3138_v50 = vand.u32 4294901760, %v922_v2 }
  0x94   :  { %3610 = vst [vmem:[#allocation20_spill] sm:$0xff] %v3101_v58  ;;  %3613 = vst [vmem:[#allocation21_spill] sm:$0xff] %v3107_v60  ;;  %1879 = vmatpush3.msra.mxu1 %v1142_v26  ;;  %v3480_v4 = vand.u32 4294901760, %v3101_v58  ;;  %v3125_v27 = vsub.f32 %v939_v62, %v3105_v31  ;;  %v3128_v36 = vsub.f32 %v923_v41, %v3107_v60  ;;  %1850 = vmatpush3.msra.mxu0 %v3103_v5 }
  0x95   :  { %3614 = vst [vmem:[#allocation13_spill] sm:$0xff] %v3115_v54  ;;  %3615 = vst [vmem:[#allocation19_spill] sm:$0xff] %v3117_v24  ;;  %1880 = vmatprep.subr.mxu1 %v1261_v46  ;;  %v1267_v3 = vsub.f32 %v3095_v16, %v3475_v34  ;;  %v3136_v20 = vsub.f32 %v938_v56, %v3117_v24  ;;  %1851 = vmatprep.subr.mxu0 %v3105_v31  ;;  %v3485_v46 = vand.u32 4294901760, %v3122_v13 }
  0x96   :  { %3616 = vst [vmem:[#allocation22_spill] sm:$0xff] %v3122_v13  ;;  %3617 = vst [vmem:[#allocation23_spill] sm:$0xff] %v3125_v27  ;;  %1881 = vmatpush3.msra.mxu1 %v1149_v1  ;;  %v1155_v62 = vsub.f32 %v3101_v58, %v3480_v4  ;;  %1852 = vmatpush3.msra.mxu0 %v3107_v60  ;;  %v3621_v56 = vand.u32 4294901760, %v3115_v54  ;;  %v3153_v1 = vsub.f32 %v922_v2, %v3138_v50 }
  0x97   :  { %3618 = vst [vmem:[#allocation24_spill] sm:$0xff] %v3128_v36  ;;  %3619 = vst [vmem:[#allocation25_spill] sm:$0xff] %v3136_v20  ;;  %v1268_v26 = vand.u32 4294901760, %v1267_v3  ;;  %v3490_v31 = vand.u32 4294901760, %v3136_v20  ;;  %1853 = vmatprep.subr.mxu0 %v3117_v24  ;;  %v1162_v41 = vsub.f32 %v3122_v13, %v3485_v46  ;;  %v3623_v34 = vand.u32 4294901760, %v3125_v27 }
  0x98   :  { %3620 = vst [vmem:[#allocation26_spill] sm:$0xff] %v3138_v50  ;;  %v1274_v16 = vsub.f32 %v3115_v54, %v3621_v56  ;;  %3622 = vst [vmem:[#allocation27_spill] sm:$0xff] %v3153_v1  ;;  %v1156_v4 = vand.u32 4294901760, %v1155_v62  ;;  %v3624_v58 = vand.u32 4294901760, %v3128_v36  ;;  %1854 = vmatpush3.msra.mxu0 %v3138_v50  ;;  %v3491_v54 = vand.u32 4294901760, %v3153_v1 }
  0x99   :  { %v1281_v3 = vsub.f32 %v3125_v27, %v3623_v34  ;;  %1882 = vmatprep.subr.mxu1 %v1268_v26  ;;  %v1288_v62 = vsub.f32 %v3136_v20, %v3490_v31  ;;  %1893 = vmatprep.subr.mxu0 %v2771_v57  ;;  %v1163_v46 = vand.u32 4294901760, %v1162_v41  ;;  %v55_v26 = vlaneseq  ;;  %v53_v41 = vld [vmem:[%s3366_s2] sm:$0x3] }
  0x9a   :  { %v1169_v56 = vsub.f32 %v3128_v36, %v3624_v58  ;;  %v1275_v2 = vand.u32 4294901760, %v1274_v16  ;;  %1883 = vmatpush3.msra.mxu1 %v1156_v4  ;;  %v1176_v58 = vsub.f32 %v3153_v1, %v3491_v54 }
  0x9b   :  { %v1282_v13 = vand.u32 4294901760, %v1281_v3  ;;  %v1289_v27 = vand.u32 4294901760, %v1288_v62  ;;  %v56_v31 = vshrl.u32 %v55_v26, 7 }
  0x9c   :  { %v1170_v34 = vand.u32 4294901760, %v1169_v56  ;;  %1884 = vmatprep.subr.mxu1 %v1275_v2  ;;  %v1177_v16 = vand.u32 4294901760, %v1176_v58 }
  0x9d   :  { %1885 = vmatpush3.msra.mxu1 %v1163_v46  ;;  %v57_v4 = vsub.s32 0, %v56_v31  ;;  %v61_v56 = vsub.s32 1, %v56_v31 }
  0x9e   :  { %1886 = vmatprep.subr.mxu1 %v1282_v13 }
  0x9f   :  { %1887 = vmatpush3.msra.mxu1 %v1170_v34  ;;  %v58_v2 = vrot.slane %v53_v41, %v57_v4  ;;  %v62_v46 = vrot.slane %v53_v41, %v61_v56 }
  0xa0   :  { %1888 = vmatprep.subr.mxu1 %v1289_v27 }
  0xa1   :  { %1889 = vmatpush3.msra.mxu1 %v1177_v16 }
  0xa2   :  { %1928 = vmatprep.subr.mxu1 %v2760_v63 }
  0xec   :  { %v168_v3 = vpop.f32.mrf.mxu0 }
  0xed   :  { %v169_v58 = vadd.f32 %v168_v3, %v58_v2 }
  0xee   :  { %v170_v62 = vpop.f32.mrf.mxu0 }
  0xef   :  { %v171_v27 = vadd.f32 %v170_v62, %v62_v46 }
  0xf3   :  { %v400_v54 = vpop.f32.mrf.mxu1 }
  0xf4   :  { %v401_v1 = vadd.f32 %v400_v54, %v169_v58  ;;  %v3630_v58 = vld [vmem:[#allocation18_spill] sm:$0xff] }
  0xf5   :  { %v402_v34 = vpop.f32.mrf.mxu1 }
  0xf6   :  { %v403_v26 = vadd.f32 %v402_v34, %v171_v27  ;;  %v3631_v34 = vld [vmem:[#allocation6_spill] sm:$0xff]  ;;  %v3632_v27 = vld [vmem:[#allocation11_spill] sm:$0xff] }
 0x10d   :  { %v537_v13 = vpop.f32.mrf.mxu0 }
 0x10e   :  { %v538_v36 = vadd.f32 %v537_v13, %v401_v1  ;;  %v3629_v13 = vld [vmem:[#allocation5_spill] sm:$0xff] }
 0x10f   :  { %v539_v16 = vpop.f32.mrf.mxu0 }
 0x110   :  { %v540_v50 = vadd.f32 %v539_v16, %v403_v26  ;;  %v3633_v16 = vld [vmem:[#allocation7_spill] sm:$0xff]  ;;  %v3634_v26 = vld [vmem:[#allocation12_spill] sm:$0xff] }
 0x115   :  { %v643_v57 = vpop.f32.mrf.mxu1 }
 0x116   :  { %v644_v24 = vadd.f32 %v643_v57, %v538_v36  ;;  %v3626_v36 = vld [vmem:[#allocation14_spill] sm:$0xff] }
 0x117   :  { %v645_v63 = vpop.f32.mrf.mxu1 }
 0x118   :  { %v646_v5 = vadd.f32 %v645_v63, %v540_v50  ;;  %v3628_v50 = vld [vmem:[#allocation15_spill] sm:$0xff] }
 0x12e   :  { %v811_v20 = vpop.f32.mrf.mxu0 }
 0x12f   :  { %v812_v31 = vadd.f32 %v811_v20, %v644_v24  ;;  %v3625_v24 = vld [vmem:[#allocation3_spill] sm:$0xff]  ;;  %v3627_v20 = vld [vmem:[#allocation4_spill] sm:$0xff] }
 0x130   :  { %v813_v60 = vpop.f32.mrf.mxu0 }
 0x131   :  { %v814_v45 = vadd.f32 %v813_v60, %v646_v5 }
 0x137   :  { %v915_v4 = vpop.f32.mrf.mxu1 }
 0x138   :  { %v916_v6 = vadd.f32 %v915_v4, %v812_v31  ;;  %v3635_v31 = vld [vmem:[#allocation8_spill] sm:$0xff]  ;;  %v3636_v4 = vld [vmem:[#allocation21_spill] sm:$0xff] }
 0x139   :  { %v917_v41 = vpop.f32.mrf.mxu1 }
 0x13a   :  { %v920_v56 = vmax.f32 %v916_v6, 0.0  ;;  %v918_v3 = vadd.f32 %v917_v41, %v814_v45  ;;  %v3637_v41 = vld [vmem:[#allocation9_spill] sm:$0xff] }
 0x13c   :  { %v3178_v2 = vand.u32 4294901760, %v920_v56  ;;  %v921_v62 = vmax.f32 %v918_v3, 0.0  ;;  %v3639_v3 = vld [vmem:[#allocation10_spill] sm:$0xff] }
 0x13e   :  { %v3181_v54 = vsub.f32 %v920_v56, %v3178_v2  ;;  %v3183_v46 = vand.u32 4294901760, %v921_v62  ;;  %v3638_v56 = vld [vmem:[#allocation19_spill] sm:$0xff] }
 0x140   :  { %v1059_v1 = vand.u32 4294901760, %v3181_v54  ;;  %v1052_v57 = vsub.f32 %v921_v62, %v3183_v46  ;;  %1292 = vmatprep.mubr.f32.mxu1 %v3183_v46  ;;  %v3640_v62 = vld [vmem:[#allocation26_spill] sm:$0xff] }
 0x141   :  { %1294 = vmatmul.mubr.f32.vlgmr.msra.gmra.mxu1 %v3178_v2 }
 0x142   :  { %1929 = vmatpush3.msra.mxu1 %v2765_v0  ;;  %v1053_v63 = vand.u32 4294901760, %v1052_v57  ;;  %v1060_v45 = vsub.f32 %v3181_v54, %v1059_v1 }
 0x143   :  { %1930 = vmatprep.subr.mxu1 %v2773_v59 }
 0x144   :  { %1931 = vmatpush3.msra.mxu1 %v2788_v21  ;;  %1536 = vmatprep.mubr.f32.mxu1 %v1053_v63  ;;  %v1054_v6 = vsub.f32 %v1052_v57, %v1053_v63  ;;  %v1061_v60 = vand.u32 4294901760, %v1060_v45  ;;  %v3642_v63 = vld [vmem:[#allocation2_spill] sm:$0xff]  ;;  %v3643_v45 = vld [vmem:[#allocation20_spill] sm:$0xff] }
 0x145   :  { %1932 = vmatprep.subr.mxu1 %v2790_v55 }
 0x146   :  { %1933 = vmatpush3.msra.mxu1 %v2792_v28  ;;  %v1055_v5 = vand.u32 4294901760, %v1054_v6  ;;  %v3644_v6 = vld [vmem:[#allocation13_spill] sm:$0xff] }
 0x147   :  { %1934 = vmatprep.subr.mxu1 %v2805_v33 }
 0x148   :  { %1935 = vmatpush3.msra.mxu1 %v2807_v52  ;;  %1056 = vmatprep.mubr.f32.mxu0 %v1055_v5  ;;  %v3645_v5 = vld [vmem:[#allocation22_spill] sm:$0xff] }
 0x149   :  { %1936 = vmatprep.subr.mxu1 %v2870_v17  ;;  %1062 = vmatmul.mubr.f32.vlgmr.msra.gmra.mxu0 %v1061_v60  ;;  %v3646_v60 = vld [vmem:[#allocation23_spill] sm:$0xff] }
 0x14a   :  { %1894 = vmatpush3.msra.mxu0 %v2786_v42  ;;  %1937 = vmatpush3.msra.mxu1 %v2881_v61 }
 0x14b   :  { %1895 = vmatprep.subr.mxu0 %v2803_v40  ;;  %1429 = vmatprep.mubr.f32.mxu0 %v1052_v57  ;;  %v3641_v57 = vld [vmem:[#allocation16_spill] sm:$0xff] }
 0x14c   :  { %1938 = vmatprep.subr.mxu1 %v2889_v22  ;;  %1896 = vmatpush3.msra.mxu0 %v2812_v14 }
 0x14d   :  { %1939 = vmatpush3.msra.mxu1 %v2895_v47  ;;  %1897 = vmatprep.subr.mxu0 %v2815_v48 }
 0x14e   :  { %1940 = vmatprep.subr.mxu1 %v2897_v49  ;;  %1898 = vmatpush3.msra.mxu0 %v2818_v7 }
 0x14f   :  { %1941 = vmatpush3.msra.mxu1 %v2899_v39  ;;  %1899 = vmatprep.subr.mxu0 %v2826_v38 }
 0x150   :  { %1942 = vmatprep.subr.mxu1 %v2906_v8  ;;  %1900 = vmatpush3.msra.mxu0 %v2829_v9 }
 0x151   :  { %1943 = vmatpush3.msra.mxu1 %v2930_v32  ;;  %1901 = vmatprep.subr.mxu0 %v2887_v53 }
 0x152   :  { %1944 = vmatprep.subr.mxu1 %v2971_v43  ;;  %1902 = vmatpush3.msra.mxu0 %v2893_v29 }
 0x153   :  { %1945 = vmatpush3.msra.mxu1 %v2982_v10  ;;  %1903 = vmatprep.subr.mxu0 %v2904_v35 }
 0x154   :  { %1946 = vmatprep.subr.mxu1 %v2993_v51  ;;  %1904 = vmatpush3.msra.mxu0 %v2914_v15 }
 0x155   :  { %1947 = vmatpush3.msra.mxu1 %v2999_v18  ;;  %1905 = vmatprep.subr.mxu0 %v2917_v37 }
 0x156   :  { %1948 = vmatprep.subr.mxu1 %v3001_v23  ;;  %1906 = vmatpush3.msra.mxu0 %v2920_v30 }
 0x157   :  { %1949 = vmatpush3.msra.mxu1 %v3003_v25  ;;  %1907 = vmatprep.subr.mxu0 %v2928_v19 }
 0x158   :  { %1950 = vmatprep.subr.mxu1 %v3013_v12  ;;  %1908 = vmatpush3.msra.mxu0 %v2948_v11 }
 0x159   :  { %1951 = vmatpush3.msra.mxu1 %v3034_v44  ;;  %1909 = vmatprep.subr.mxu0 %v3625_v24 }
 0x15a   :  { %1952 = vmatprep.subr.mxu1 %v3626_v36  ;;  %1910 = vmatpush3.msra.mxu0 %v3627_v20 }
 0x15b   :  { %1953 = vmatpush3.msra.mxu1 %v3628_v50  ;;  %1911 = vmatprep.subr.mxu0 %v3629_v13 }
 0x15c   :  { %1954 = vmatprep.subr.mxu1 %v3630_v58  ;;  %1912 = vmatpush3.msra.mxu0 %v3631_v34 }
 0x15d   :  { %1955 = vmatpush3.msra.mxu1 %v3632_v27  ;;  %1913 = vmatprep.subr.mxu0 %v3633_v16 }
 0x15e   :  { %1956 = vmatprep.subr.mxu1 %v3634_v26  ;;  %1914 = vmatpush3.msra.mxu0 %v3635_v31 }
 0x15f   :  { %1957 = vmatpush3.msra.mxu1 %v3636_v4  ;;  %1915 = vmatprep.subr.mxu0 %v3637_v41 }
 0x160   :  { %1958 = vmatprep.subr.mxu1 %v3638_v56  ;;  %1916 = vmatpush3.msra.mxu0 %v3639_v3 }
 0x161   :  { %1959 = vmatpush3.msra.mxu1 %v3640_v62  ;;  %1917 = vmatprep.subr.mxu0 %v3641_v57 }
 0x162   :  { %1540 = vmatmul.mubr.f32.vlgmr.msra.gmra.mxu1 %v1059_v1  ;;  %1998 = vmatprep.subr.mxu1 %v3642_v63  ;;  %v3647_v1 = vld [vmem:[#allocation24_spill] sm:$0xff]  ;;  %v3648_v63 = vld [vmem:[#allocation25_spill] sm:$0xff] }
 0x163   :  { %1918 = vmatpush3.msra.mxu0 %v3643_v45  ;;  %1999 = vmatpush3.msra.mxu1 %v2765_v0  ;;  %v3649_v0 = vld [vmem:[#allocation27_spill] sm:$0xff] }
 0x164   :  { %1810 = vmatprep.mubr.f32.mxu1 %v3183_v46  ;;  %1919 = vmatprep.subr.mxu0 %v3644_v6 }
 0x165   :  { %2000 = vmatprep.subr.mxu1 %v2773_v59  ;;  %1920 = vmatpush3.msra.mxu0 %v3645_v5  ;;  %v3650_v59 = vld [vmem:[#allocation17_spill] sm:$0xff] }
 0x166   :  { %2001 = vmatpush3.msra.mxu1 %v2788_v21  ;;  %1921 = vmatprep.subr.mxu0 %v3646_v60  ;;  %v3651_v21 = vand.u32 4294901760, %v3650_v59 }
 0x167   :  { %2002 = vmatprep.subr.mxu1 %v2790_v55  ;;  %1922 = vmatpush3.msra.mxu0 %v3647_v1  ;;  %v3652_v55 = vand.u32 4294901760, %v2786_v42  ;;  %v3656_v42 = vand.u32 4294901760, %v2818_v7  ;;  %v3660_v7 = vand.u32 4294901760, %v2893_v29  ;;  %v3667_v29 = vand.u32 4294901760, %v3625_v24  ;;  %v954_v24 = vld [vmem:[%s3367_s4] sm:$0x1] }
 0x168   :  { %2003 = vmatpush3.msra.mxu1 %v2792_v28  ;;  %1923 = vmatprep.subr.mxu0 %v3648_v63  ;;  %v3653_v28 = vand.u32 4294901760, %v2803_v40  ;;  %v3657_v40 = vand.u32 4294901760, %v2826_v38  ;;  %v3661_v38 = vand.u32 4294901760, %v2904_v35  ;;  %v3671_v35 = vand.u32 4294901760, %v3633_v16 }
 0x169   :  { %2004 = vmatprep.subr.mxu1 %v2805_v33  ;;  %1924 = vmatpush3.msra.mxu0 %v3649_v0  ;;  %v3654_v33 = vand.u32 4294901760, %v2812_v14  ;;  %v3658_v14 = vand.u32 4294901760, %v2829_v9  ;;  %v3662_v9 = vand.u32 4294901760, %v2914_v15  ;;  %v3674_v15 = vand.u32 4294901760, %v3639_v3 }
 0x16a   :  { %2005 = vmatpush3.msra.mxu1 %v2807_v52  ;;  %1432 = vmatmul.mubr.f32.vlgmr.msra.gmra.mxu0 %v3181_v54  ;;  %v3655_v52 = vand.u32 4294901760, %v2815_v48  ;;  %v3659_v48 = vand.u32 4294901760, %v2887_v53  ;;  %v3665_v53 = vand.u32 4294901760, %v2928_v19  ;;  %v3677_v19 = vand.u32 4294901760, %v3644_v6 }
 0x16b   :  { %1963 = vmatprep.subr.mxu0 %v3651_v21  ;;  %2006 = vmatprep.subr.mxu1 %v2870_v17  ;;  %v3663_v17 = vand.u32 4294901760, %v2917_v37  ;;  %v3675_v37 = vand.u32 4294901760, %v3641_v57 }
 0x16c   :  { %1964 = vmatpush3.msra.mxu0 %v3652_v55  ;;  %1706 = vmatprep.mubr.f32.mxu0 %v3183_v46 }
 0x16d   :  { %2007 = vmatpush3.msra.mxu1 %v2881_v61  ;;  %1965 = vmatprep.subr.mxu0 %v3653_v28  ;;  %v3664_v61 = vand.u32 4294901760, %v2920_v30  ;;  %v3676_v30 = vand.u32 4294901760, %v3643_v45 }
 0x16e   :  { %2008 = vmatprep.subr.mxu1 %v2889_v22  ;;  %1966 = vmatpush3.msra.mxu0 %v3654_v33  ;;  %v3666_v22 = vand.u32 4294901760, %v2948_v11  ;;  %v3680_v11 = vand.u32 4294901760, %v3647_v1 }
 0x16f   :  { %2009 = vmatpush3.msra.mxu1 %v2895_v47  ;;  %1967 = vmatprep.subr.mxu0 %v3655_v52  ;;  %v3668_v47 = vand.u32 4294901760, %v3627_v20 }
 0x170   :  { %2010 = vmatprep.subr.mxu1 %v2897_v49  ;;  %1968 = vmatpush3.msra.mxu0 %v3656_v42  ;;  %v3669_v49 = vand.u32 4294901760, %v3629_v13 }
 0x171   :  { %2011 = vmatpush3.msra.mxu1 %v2899_v39  ;;  %1969 = vmatprep.subr.mxu0 %v3657_v40  ;;  %v3670_v39 = vand.u32 4294901760, %v3631_v34 }
 0x172   :  { %2012 = vmatprep.subr.mxu1 %v2906_v8  ;;  %1970 = vmatpush3.msra.mxu0 %v3658_v14  ;;  %v3672_v8 = vand.u32 4294901760, %v3635_v31 }
 0x173   :  { %2013 = vmatpush3.msra.mxu1 %v2930_v32  ;;  %1971 = vmatprep.subr.mxu0 %v3659_v48  ;;  %v3678_v32 = vand.u32 4294901760, %v3645_v5 }
 0x174   :  { %2014 = vmatprep.subr.mxu1 %v2971_v43  ;;  %1972 = vmatpush3.msra.mxu0 %v3660_v7  ;;  %v3681_v43 = vand.u32 4294901760, %v3648_v63 }
 0x175   :  { %2015 = vmatpush3.msra.mxu1 %v2982_v10  ;;  %1973 = vmatprep.subr.mxu0 %v3661_v38  ;;  %v3679_v10 = vand.u32 4294901760, %v3646_v60 }
 0x176   :  { %2016 = vmatprep.subr.mxu1 %v2993_v51  ;;  %1974 = vmatpush3.msra.mxu0 %v3662_v9  ;;  %v3673_v51 = vand.u32 4294901760, %v3637_v41 }
 0x177   :  { %2017 = vmatpush3.msra.mxu1 %v2999_v18  ;;  %1975 = vmatprep.subr.mxu0 %v3663_v17  ;;  %v3682_v18 = vand.u32 4294901760, %v3649_v0 }
 0x178   :  { %2018 = vmatprep.subr.mxu1 %v3001_v23  ;;  %1976 = vmatpush3.msra.mxu0 %v3664_v61 }
 0x179   :  { %2019 = vmatpush3.msra.mxu1 %v3003_v25  ;;  %1977 = vmatprep.subr.mxu0 %v3665_v53 }
 0x17a   :  { %2020 = vmatprep.subr.mxu1 %v3013_v12  ;;  %1978 = vmatpush3.msra.mxu0 %v3666_v22 }
 0x17b   :  { %2021 = vmatpush3.msra.mxu1 %v3034_v44  ;;  %1979 = vmatprep.subr.mxu0 %v3667_v29 }
 0x17c   :  { %2022 = vmatprep.subr.mxu1 %v3626_v36  ;;  %1980 = vmatpush3.msra.mxu0 %v3668_v47 }
 0x17d   :  { %2023 = vmatpush3.msra.mxu1 %v3628_v50  ;;  %1981 = vmatprep.subr.mxu0 %v3669_v49 }
 0x17e   :  { %2024 = vmatprep.subr.mxu1 %v3630_v58  ;;  %1982 = vmatpush3.msra.mxu0 %v3670_v39 }
 0x17f   :  { %2025 = vmatpush3.msra.mxu1 %v3632_v27  ;;  %1983 = vmatprep.subr.mxu0 %v3671_v35 }
 0x180   :  { %2026 = vmatprep.subr.mxu1 %v3634_v26  ;;  %1984 = vmatpush3.msra.mxu0 %v3672_v8 }
 0x181   :  { %2027 = vmatpush3.msra.mxu1 %v3636_v4  ;;  %1985 = vmatprep.subr.mxu0 %v3673_v51 }
 0x182   :  { %2028 = vmatprep.subr.mxu1 %v3638_v56  ;;  %1986 = vmatpush3.msra.mxu0 %v3674_v15 }
 0x183   :  { %2029 = vmatpush3.msra.mxu1 %v3640_v62  ;;  %1987 = vmatprep.subr.mxu0 %v3675_v37 }
 0x184   :  { %1812 = vmatmul.mubr.f32.vlgmr.msra.gmra.mxu1 %v3178_v2  ;;  %1988 = vmatpush3.msra.mxu0 %v3676_v30 }
 0x185   :  { %1989 = vmatprep.subr.mxu0 %v3677_v19 }
 0x186   :  { %1990 = vmatpush3.msra.mxu0 %v3678_v32 }
 0x187   :  { %1991 = vmatprep.subr.mxu0 %v3679_v10 }
 0x188   :  { %1992 = vmatpush3.msra.mxu0 %v3680_v11 }
 0x189   :  { %1993 = vmatprep.subr.mxu0 %v3681_v43 }
 0x18a   :  { %1994 = vmatpush3.msra.mxu0 %v3682_v18 }
 0x18b   :  { %1708 = vmatmul.mubr.f32.vlgmr.msra.gmra.mxu0 %v3178_v2 }
 0x201   :  { %v1890_v25 = vpop.f32.mrf.mxu1 }
 0x203   :  { %v1891_v46 = vpop.f32.mrf.mxu1 }
 0x204   :  { %v1892_v13 = vadd.f32 %v1891_v46, %v1890_v25 }
 0x209   :  { %v1855_v23 = vpop.f32.mrf.mxu0 }
 0x20b   :  { %v1856_v12 = vpop.f32.mrf.mxu0 }
 0x20c   :  { %v1857_v54 = vadd.f32 %v1856_v12, %v1855_v23 }
 0x20e   :  { %v1064_v50 = vadd.f32 %v1857_v54, %v954_v24 }
 0x210   :  { %v1296_v27 = vadd.f32 %v1892_v13, %v1064_v50 }
 0x222   :  { %v1960_v36 = vpop.f32.mrf.mxu1 }
 0x224   :  { %v1961_v34 = vpop.f32.mrf.mxu1 }
 0x225   :  { %v1962_v31 = vadd.f32 %v1961_v34, %v1960_v36 }
 0x22a   :  { %v1925_v44 = vpop.f32.mrf.mxu0 }
 0x22c   :  { %v1926_v20 = vpop.f32.mrf.mxu0 }
 0x22d   :  { %v1927_v58 = vadd.f32 %v1926_v20, %v1925_v44 }
 0x22f   :  { %v1434_v26 = vadd.f32 %v1927_v58, %v1296_v27 }
 0x231   :  { %v1542_v56 = vadd.f32 %v1962_v31, %v1434_v26 }
 0x244   :  { %v2030_v16 = vpop.f32.mrf.mxu1 }
 0x246   :  { %v2031_v4 = vpop.f32.mrf.mxu1 }
 0x247   :  { %v2032_v62 = vadd.f32 %v2031_v4, %v2030_v16 }
 0x24b   :  { %v1995_v2 = vpop.f32.mrf.mxu0 }
 0x24d   :  { %v1996_v41 = vpop.f32.mrf.mxu0 }
 0x24e   :  { %v1997_v3 = vadd.f32 %v1996_v41, %v1995_v2 }
 0x250   :  { %v1710_v57 = vadd.f32 %v1997_v3, %v1542_v56 }
 0x252   :  { %v1814_v45 = vadd.f32 %v2032_v62, %v1710_v57 }
 0x254   :  { %1818 = vst.msk [vmem:[%s3368_s5] sm:$0x1] %vm1817_vm0, %v1814_v45 }

</bundles_post_ra>
